<compile_context>
chip_gen: v6e
topology: v6e:2x2x1
jax: 0.10.0
libtpu: 0.0.40
codegen_flags: <defaults>
</compile_context>

<pallas_src>
import math

import jax
import jax.numpy as jnp
from jax.experimental import pallas as pl
from jax.experimental.pallas import tpu as pltpu

# ---- model hyper-params (small, consistent with the module) ----
BATCH = 2
SEQ = 8
D_MODEL = 32
N_HEAD = 4
D_HEAD = D_MODEL // N_HEAD
D_FF = 64
N_LAYER = 2
EPS = 1e-5          # nn.LayerNorm default
NEG_INF = -1e9      # matches PyTorch masked_fill(mask == 0, -1e9)


def _layernorm(x, gamma, beta):
    # x: (N, D) f32; gamma/beta: (1, D) f32 — all-f32 elementwise math (v5e-safe).
    mu = jnp.mean(x, axis=-1, keepdims=True)
    var = jnp.mean((x - mu) ** 2, axis=-1, keepdims=True)
    return (x - mu) * jax.lax.rsqrt(var + EPS) * gamma + beta


def encoder_kernel(x_ref, bias_ref, pvec_ref,
                   wqkv_ref, wo_ref, w1_ref, w2_ref,
                   o_ref):
    """All N_LAYER encoder blocks fused; activation stays resident in VMEM/vregs.

    x_ref    : (N, D)      f32   activation slab (batch folded into rows, N = B*S)
    bias_ref : (N, N)      f32   additive attention bias (0 attend / -1e9 masked),
                                 block-diagonal over batch — precomputed outside.
    pvec_ref : (8, 128)    f32   packed small params:
                                 rows 0-3: ln1_g, ln1_b, ln2_g, ln2_b   (first D lanes)
                                 row  4  : fused qkv bias               (first 3D lanes)
                                 row  5  : bo                            (first D lanes)
                                 row  6  : b1                            (first F lanes)
                                 row  7  : b2                            (first D lanes)
    wqkv_ref : (D, 3D)     bf16  [Wq*scale | Wk | Wv]
    wo_ref   : (D, D)      bf16
    w1_ref   : (D, F) bf16 ; w2_ref : (F, D) bf16
    """
    N, D = x_ref.shape
    H, dh = N_HEAD, D_HEAD
    F = w1_ref.shape[1]
    bf16 = jnp.bfloat16
    f32 = jnp.float32

    x = x_ref[...]                       # (N, D) f32 residual stream
    bias = bias_ref[...]                 # (N, N) f32 additive mask bias

    pv = pvec_ref[...]                   # (8, 128) — one vreg of packed params
    ln1_g, ln1_b = pv[0:1, :D], pv[1:2, :D]
    ln2_g, ln2_b = pv[2:3, :D], pv[3:4, :D]
    bqkv = pv[4:5, :3 * D]
    bo = pv[5:6, :D]
    b1 = pv[6:7, :F]
    b2 = pv[7:8, :D]

    wqkv = wqkv_ref[...]                 # (D, 3D) bf16 — 1/sqrt(dh) folded into Wq
    wo = wo_ref[...]                     # (D, D)  bf16
    w1 = w1_ref[...]                     # (D, F)  bf16
    w2 = w2_ref[...]                     # (F, D)  bf16

    # deepcopy semantics: every layer shares the same parameter values.
    # (At N_LAYER=2 a fully-unrolled Python loop is fine; use lax.fori_loop if it grows.)
    for _ in range(N_LAYER):
        # ---------------- self-attention sublayer (pre-norm residual) ----------------
        xn = _layernorm(x, ln1_g, ln1_b)                                   # (N, D) f32
        qkv = jnp.dot(xn.astype(bf16), wqkv,
                      preferred_element_type=f32) + bqkv                   # (N, 3D) f32
        q = qkv[:, 0:D]
        k = qkv[:, D:2 * D]
        v = qkv[:, 2 * D:3 * D]

        # Per-head scores / softmax / attn@V; heads are static lane slices.
        # NOTE: fully-masked query rows mix (near-)uniformly over all keys rather
        # than NaN — same behaviour class as the reference; not triggered here.
        head_outs = []
        for h in range(H):
            sl = slice(h * dh, (h + 1) * dh)
            qh = q[:, sl].astype(bf16)                                     # (N, dh)
            kh = k[:, sl].astype(bf16)
            vh = v[:, sl].astype(bf16)
            s = jax.lax.dot_general(qh, kh,
                                    dimension_numbers=(((1,), (1,)), ((), ())),
                                    preferred_element_type=f32)            # (N, N) f32
            s = s + bias                                                   # scale pre-folded
            m = jnp.max(s, axis=-1, keepdims=True)
            p = jnp.exp(s - m)
            denom = jnp.sum(p, axis=-1, keepdims=True)
            p = p * pl.reciprocal(denom, approx=True)                      # EUP, not VALU divide
            head_outs.append(jnp.dot(p.astype(bf16), vh,
                                     preferred_element_type=f32))          # (N, dh) f32

        attn = jnp.concatenate(head_outs, axis=-1)                         # (N, D) — head concat
        x = x + jnp.dot(attn.astype(bf16), wo,
                        preferred_element_type=f32) + bo                   # single output proj

        # ---------------- position-wise feed-forward sublayer ----------------
        xn2 = _layernorm(x, ln2_g, ln2_b)                                  # (N, D) f32
        h1 = jnp.dot(xn2.astype(bf16), w1, preferred_element_type=f32) + b1
        h1 = jnp.maximum(h1, 0.0)
        x = x + jnp.dot(h1.astype(bf16), w2, preferred_element_type=f32) + b2

    o_ref[...] = x                                                         # single full store


def _prep_params(params):
    """Fuse QKV weights, fold the 1/sqrt(dh) scale, pack small vectors (plain XLA)."""
    D, F = D_MODEL, D_FF
    bf = jnp.bfloat16
    scale = 1.0 / math.sqrt(D_HEAD)

    wqkv = jnp.concatenate(
        [params["wq"] * scale, params["wk"], params["wv"]], axis=1).astype(bf)   # (D, 3D)
    bqkv = jnp.concatenate(
        [params["bq"] * scale, params["bk"], params["bv"]], axis=1)              # (1, 3D)

    pvec = jnp.zeros((8, 128), jnp.float32)
    pvec = pvec.at[0, :D].set(params["ln1_g"][0])
    pvec = pvec.at[1, :D].set(params["ln1_b"][0])
    pvec = pvec.at[2, :D].set(params["ln2_g"][0])
    pvec = pvec.at[3, :D].set(params["ln2_b"][0])
    pvec = pvec.at[4, :3 * D].set(bqkv[0])
    pvec = pvec.at[5, :D].set(params["bo"][0])
    pvec = pvec.at[6, :F].set(params["b1"][0])
    pvec = pvec.at[7, :D].set(params["b2"][0])

    return (pvec, wqkv,
            params["wo"].astype(bf), params["w1"].astype(bf), params["w2"].astype(bf))


def _block_diag_mask(src_mask):
    """(B, Sq, Sk) attend-mask -> (B*Sq, B*Sk) block-diagonal mask (0 off-diagonal)."""
    B, Sq, Sk = src_mask.shape
    eye = jnp.eye(B, dtype=src_mask.dtype)
    big = eye[:, None, :, None] * src_mask[:, :, None, :]   # (B, Sq, B, Sk)
    return big.reshape(B * Sq, B * Sk)


@jax.jit
def encoder_forward(src, src_mask, params):
    """Encoder.forward: n_layer shared-weight blocks, fused into one Pallas kernel."""
    B, S, D = src.shape
    N = B * S
    x2 = src.reshape(N, D)                                       # (B*S, D) activation slab
    mask2 = _block_diag_mask(src_mask)
    bias2 = jnp.where(mask2 > 0, 0.0, NEG_INF).astype(jnp.float32)   # precomputed additive bias
    pvec, wqkv, wo, w1, w2 = _prep_params(params)

    flops = N_LAYER * (
        2 * N * D * (3 * D)                     # fused QKV projection
        + 2 * 2 * N_HEAD * N * N * D_HEAD       # scores + attn @ V
        + 2 * N * D * D                         # output projection
        + 2 * 2 * N * D * D_FF                  # feed-forward
    )
    bytes_accessed = (x2.size * 4 + bias2.size * 4 + N * D * 4 + pvec.size * 4
                      + (wqkv.size + wo.size + w1.size + w2.size) * 2)
    cost = pl.CostEstimate(
        flops=int(flops),
        transcendentals=int(N_LAYER * N_HEAD * N * N),           # softmax exps
        bytes_accessed=int(bytes_accessed),
    )

    vmem = pl.BlockSpec(memory_space=pltpu.MemorySpace.VMEM)
    out2 = pl.pallas_call(
        encoder_kernel,
        out_shape=jax.ShapeDtypeStruct((N, D), jnp.float32),
        in_specs=[vmem] * 7,
        out_specs=vmem,
        cost_estimate=cost,
    )(x2, bias2, pvec, wqkv, wo, w1, w2)
    return out2.reshape(B, S, D)


# ---------------- pure-JAX f32 reference (sanity check) ----------------
def encoder_block_ref(x, mask, p):
    def ln(x, g, b):
        mu = jnp.mean(x, axis=-1, keepdims=True)
        var = jnp.mean((x - mu) ** 2, axis=-1, keepdims=True)
        return (x - mu) / jnp.sqrt(var + EPS) * g + b

    B, S, D = x.shape
    dh = D // N_HEAD
    xn = ln(x, p["ln1_g"][0], p["ln1_b"][0])
    q = xn @ p["wq"] + p["bq"][0]
    k = xn @ p["wk"] + p["bk"][0]
    v = xn @ p["wv"] + p["bv"][0]
    q = q.reshape(B, S, N_HEAD, dh).transpose(0, 2, 1, 3)
    k = k.reshape(B, S, N_HEAD, dh).transpose(0, 2, 1, 3)
    v = v.reshape(B, S, N_HEAD, dh).transpose(0, 2, 1, 3)
    s = jnp.einsum("bhqd,bhkd->bhqk", q, k) / (dh ** 0.5)
    s = jnp.where(mask[:, None, :, :] > 0, s, NEG_INF)
    pr = jax.nn.softmax(s, axis=-1)
    o = jnp.einsum("bhqk,bhkd->bhqd", pr, v).transpose(0, 2, 1, 3).reshape(B, S, D)
    x = x + (o @ p["wo"] + p["bo"][0])
    xn2 = ln(x, p["ln2_g"][0], p["ln2_b"][0])
    h = jnp.maximum(xn2 @ p["w1"] + p["b1"][0], 0.0)
    return x + (h @ p["w2"] + p["b2"][0])


def encoder_ref(src, mask, params, n_layer=N_LAYER):
    out = src
    for _ in range(n_layer):
        out = encoder_block_ref(out, mask, params)
    return out


def init_params(key):
    ks = jax.random.split(key, 8)
    std = 0.02
    D, F = D_MODEL, D_FF
    return {
        "ln1_g": jnp.ones((1, D), jnp.float32),
        "ln1_b": jnp.zeros((1, D), jnp.float32),
        "wq": std * jax.random.normal(ks[0], (D, D), jnp.float32),
        "bq": jnp.zeros((1, D), jnp.float32),
        "wk": std * jax.random.normal(ks[1], (D, D), jnp.float32),
        "bk": jnp.zeros((1, D), jnp.float32),
        "wv": std * jax.random.normal(ks[2], (D, D), jnp.float32),
        "bv": jnp.zeros((1, D), jnp.float32),
        "wo": std * jax.random.normal(ks[3], (D, D), jnp.float32),
        "bo": jnp.zeros((1, D), jnp.float32),
        "ln2_g": jnp.ones((1, D), jnp.float32),
        "ln2_b": jnp.zeros((1, D), jnp.float32),
        "w1": std * jax.random.normal(ks[4], (D, F), jnp.float32),
        "b1": jnp.zeros((1, F), jnp.float32),
        "w2": std * jax.random.normal(ks[5], (F, D), jnp.float32),
        "b2": jnp.zeros((1, D), jnp.float32),
    }


if __name__ == "__main__":
    key = jax.random.PRNGKey(0)
    k_x, k_p = jax.random.split(key)

    src = jax.random.normal(k_x, (BATCH, SEQ, D_MODEL), jnp.float32)

    # padding-style src_mask: batch 0 fully valid, batch 1 has last 2 keys padded
    lengths = jnp.array([SEQ, SEQ - 2], jnp.int32)
    key_valid = (jnp.arange(SEQ)[None, :] < lengths[:, None]).astype(jnp.float32)   # (B, S)
    src_mask = jnp.broadcast_to(key_valid[:, None, :], (BATCH, SEQ, SEQ))           # (B, Sq, Sk)

    params = init_params(k_p)   # one block's params, shared across layers (deepcopy semantics)

    out = encoder_forward(src, src_mask, params)
    out = jax.block_until_ready(out)

    ref = encoder_ref(src, src_mask, params)
    assert out.shape == (BATCH, SEQ, D_MODEL)
    # bf16 MXU operands + approx reciprocal => compare against the f32 reference
    # with a correspondingly relaxed (but still tight) tolerance.
    assert jnp.allclose(out, ref, rtol=1e-2, atol=1e-2), "mismatch vs. JAX reference"

    print("KERNEL_OK")
</pallas_src>

<mosaic_0001>
module attributes {stable_mosaic.version = 11 : i64} {
  func.func @encoder_kernel(%arg0: memref<16x32xf32, #tpu.memory_space<vmem>>, %arg1: memref<16x16xf32, #tpu.memory_space<vmem>>, %arg2: memref<8x128xf32, #tpu.memory_space<vmem>>, %arg3: memref<32x96xbf16, #tpu.memory_space<vmem>>, %arg4: memref<32x32xbf16, #tpu.memory_space<vmem>>, %arg5: memref<32x64xbf16, #tpu.memory_space<vmem>>, %arg6: memref<64x32xbf16, #tpu.memory_space<vmem>>, %arg7: memref<16x32xf32, #tpu.memory_space<vmem>>) attributes {dimension_semantics = [], scalar_prefetch = 0 : i64, scratch_operands = 0 : i64, tpu.core_type = #tpu.core_type<tc>} {
    %c0 = arith.constant 0 : index
    %c0_0 = arith.constant 0 : index
    %0 = vector.load %arg0[%c0, %c0_0] : memref<16x32xf32, #tpu.memory_space<vmem>>, vector<16x32xf32>
    %c0_1 = arith.constant 0 : index
    %c0_2 = arith.constant 0 : index
    %1 = vector.load %arg1[%c0_1, %c0_2] : memref<16x16xf32, #tpu.memory_space<vmem>>, vector<16x16xf32>
    %c0_3 = arith.constant 0 : index
    %c0_4 = arith.constant 0 : index
    %2 = vector.load %arg2[%c0_3, %c0_4] : memref<8x128xf32, #tpu.memory_space<vmem>>, vector<8x128xf32>
    %3 = vector.extract_strided_slice %2 {offsets = [0, 0], sizes = [1, 32], strides = [1, 1]} : vector<8x128xf32> to vector<1x32xf32>
    %4 = vector.extract_strided_slice %2 {offsets = [1, 0], sizes = [1, 32], strides = [1, 1]} : vector<8x128xf32> to vector<1x32xf32>
    %5 = vector.extract_strided_slice %2 {offsets = [2, 0], sizes = [1, 32], strides = [1, 1]} : vector<8x128xf32> to vector<1x32xf32>
    %6 = vector.extract_strided_slice %2 {offsets = [3, 0], sizes = [1, 32], strides = [1, 1]} : vector<8x128xf32> to vector<1x32xf32>
    %7 = vector.extract_strided_slice %2 {offsets = [4, 0], sizes = [1, 96], strides = [1, 1]} : vector<8x128xf32> to vector<1x96xf32>
    %8 = vector.extract_strided_slice %2 {offsets = [5, 0], sizes = [1, 32], strides = [1, 1]} : vector<8x128xf32> to vector<1x32xf32>
    %9 = vector.extract_strided_slice %2 {offsets = [6, 0], sizes = [1, 64], strides = [1, 1]} : vector<8x128xf32> to vector<1x64xf32>
    %10 = vector.extract_strided_slice %2 {offsets = [7, 0], sizes = [1, 32], strides = [1, 1]} : vector<8x128xf32> to vector<1x32xf32>
    %c0_5 = arith.constant 0 : index
    %c0_6 = arith.constant 0 : index
    %11 = vector.load %arg3[%c0_5, %c0_6] : memref<32x96xbf16, #tpu.memory_space<vmem>>, vector<32x96xbf16>
    %c0_7 = arith.constant 0 : index
    %c0_8 = arith.constant 0 : index
    %12 = vector.load %arg4[%c0_7, %c0_8] : memref<32x32xbf16, #tpu.memory_space<vmem>>, vector<32x32xbf16>
    %c0_9 = arith.constant 0 : index
    %c0_10 = arith.constant 0 : index
    %13 = vector.load %arg5[%c0_9, %c0_10] : memref<32x64xbf16, #tpu.memory_space<vmem>>, vector<32x64xbf16>
    %c0_11 = arith.constant 0 : index
    %c0_12 = arith.constant 0 : index
    %14 = vector.load %arg6[%c0_11, %c0_12] : memref<64x32xbf16, #tpu.memory_space<vmem>>, vector<64x32xbf16>
    %cst = arith.constant dense<0.000000e+00> : vector<16xf32>
    %15 = vector.multi_reduction <add>, %0, %cst [1] : vector<16x32xf32> to vector<16xf32>
    %16 = vector.shape_cast %15 : vector<16xf32> to vector<16x1xf32>
    %cst_13 = arith.constant 3.200000e+01 : f32
    %17 = vector.broadcast %cst_13 : f32 to vector<16x1xf32>
    %18 = arith.divf %16, %17 : vector<16x1xf32>
    %19 = vector.broadcast %18 : vector<16x1xf32> to vector<16x32xf32>
    %20 = arith.subf %0, %19 : vector<16x32xf32>
    %21 = arith.mulf %20, %20 : vector<16x32xf32>
    %cst_14 = arith.constant dense<0.000000e+00> : vector<16xf32>
    %22 = vector.multi_reduction <add>, %21, %cst_14 [1] : vector<16x32xf32> to vector<16xf32>
    %23 = vector.shape_cast %22 : vector<16xf32> to vector<16x1xf32>
    %cst_15 = arith.constant 3.200000e+01 : f32
    %24 = vector.broadcast %cst_15 : f32 to vector<16x1xf32>
    %25 = arith.divf %23, %24 : vector<16x1xf32>
    %26 = vector.broadcast %18 : vector<16x1xf32> to vector<16x32xf32>
    %27 = arith.subf %0, %26 : vector<16x32xf32>
    %cst_16 = arith.constant 9.99999974E-6 : f32
    %28 = vector.broadcast %cst_16 : f32 to vector<16x1xf32>
    %29 = arith.addf %25, %28 : vector<16x1xf32>
    %30 = math.rsqrt %29 : vector<16x1xf32>
    %31 = vector.broadcast %30 : vector<16x1xf32> to vector<16x32xf32>
    %32 = arith.mulf %27, %31 : vector<16x32xf32>
    %33 = vector.broadcast %3 : vector<1x32xf32> to vector<16x32xf32>
    %34 = arith.mulf %32, %33 : vector<16x32xf32>
    %35 = vector.broadcast %4 : vector<1x32xf32> to vector<16x32xf32>
    %36 = arith.addf %34, %35 : vector<16x32xf32>
    %37 = arith.truncf %36 : vector<16x32xf32> to vector<16x32xbf16>
    %cst_17 = arith.constant dense<0.000000e+00> : vector<16x96xf32>
    %38 = tpu.matmul %37, %11, %cst_17 {dimension_numbers = #tpu.dot_dimension_numbers<[1], [0], [0], [1], [0, 0, 1, 1], [], []>} : vector<16x32xbf16>, vector<32x96xbf16>, vector<16x96xf32> -> vector<16x96xf32>
    %39 = vector.broadcast %7 : vector<1x96xf32> to vector<16x96xf32>
    %40 = arith.addf %38, %39 : vector<16x96xf32>
    %41 = vector.extract_strided_slice %40 {offsets = [0, 0], sizes = [16, 32], strides = [1, 1]} : vector<16x96xf32> to vector<16x32xf32>
    %42 = vector.extract_strided_slice %40 {offsets = [0, 32], sizes = [16, 32], strides = [1, 1]} : vector<16x96xf32> to vector<16x32xf32>
    %43 = vector.extract_strided_slice %40 {offsets = [0, 64], sizes = [16, 32], strides = [1, 1]} : vector<16x96xf32> to vector<16x32xf32>
    %44 = vector.extract_strided_slice %41 {offsets = [0, 0], sizes = [16, 8], strides = [1, 1]} : vector<16x32xf32> to vector<16x8xf32>
    %45 = arith.truncf %44 : vector<16x8xf32> to vector<16x8xbf16>
    %46 = vector.extract_strided_slice %42 {offsets = [0, 0], sizes = [16, 8], strides = [1, 1]} : vector<16x32xf32> to vector<16x8xf32>
    %47 = arith.truncf %46 : vector<16x8xf32> to vector<16x8xbf16>
    %48 = vector.extract_strided_slice %43 {offsets = [0, 0], sizes = [16, 8], strides = [1, 1]} : vector<16x32xf32> to vector<16x8xf32>
    %49 = arith.truncf %48 : vector<16x8xf32> to vector<16x8xbf16>
    %cst_18 = arith.constant dense<0.000000e+00> : vector<16x16xf32>
    %50 = tpu.matmul %45, %47, %cst_18 {dimension_numbers = #tpu.dot_dimension_numbers<[1], [1], [0], [0], [0, 0, 1, 0], [], []>} : vector<16x8xbf16>, vector<16x8xbf16>, vector<16x16xf32> -> vector<16x16xf32>
    %51 = arith.addf %50, %1 : vector<16x16xf32>
    %cst_19 = arith.constant dense<0xFF800000> : vector<16xf32>
    %52 = vector.multi_reduction <maximumf>, %51, %cst_19 [1] : vector<16x16xf32> to vector<16xf32>
    %53 = vector.shape_cast %52 : vector<16xf32> to vector<16x1xf32>
    %54 = vector.broadcast %53 : vector<16x1xf32> to vector<16x16xf32>
    %55 = arith.subf %51, %54 : vector<16x16xf32>
    %56 = math.exp %55 : vector<16x16xf32>
    %cst_20 = arith.constant dense<0.000000e+00> : vector<16xf32>
    %57 = vector.multi_reduction <add>, %56, %cst_20 [1] : vector<16x16xf32> to vector<16xf32>
    %58 = vector.shape_cast %57 : vector<16xf32> to vector<16x1xf32>
    %59 = tpu.reciprocal %58 {approx = true} : vector<16x1xf32> -> vector<16x1xf32>
    %60 = vector.broadcast %59 : vector<16x1xf32> to vector<16x16xf32>
    %61 = arith.mulf %56, %60 : vector<16x16xf32>
    %62 = arith.truncf %61 : vector<16x16xf32> to vector<16x16xbf16>
    %cst_21 = arith.constant dense<0.000000e+00> : vector<16x8xf32>
    %63 = tpu.matmul %62, %49, %cst_21 {dimension_numbers = #tpu.dot_dimension_numbers<[1], [0], [0], [1], [0, 0, 1, 1], [], []>} : vector<16x16xbf16>, vector<16x8xbf16>, vector<16x8xf32> -> vector<16x8xf32>
    %64 = vector.extract_strided_slice %41 {offsets = [0, 8], sizes = [16, 8], strides = [1, 1]} : vector<16x32xf32> to vector<16x8xf32>
    %65 = arith.truncf %64 : vector<16x8xf32> to vector<16x8xbf16>
    %66 = vector.extract_strided_slice %42 {offsets = [0, 8], sizes = [16, 8], strides = [1, 1]} : vector<16x32xf32> to vector<16x8xf32>
    %67 = arith.truncf %66 : vector<16x8xf32> to vector<16x8xbf16>
    %68 = vector.extract_strided_slice %43 {offsets = [0, 8], sizes = [16, 8], strides = [1, 1]} : vector<16x32xf32> to vector<16x8xf32>
    %69 = arith.truncf %68 : vector<16x8xf32> to vector<16x8xbf16>
    %cst_22 = arith.constant dense<0.000000e+00> : vector<16x16xf32>
    %70 = tpu.matmul %65, %67, %cst_22 {dimension_numbers = #tpu.dot_dimension_numbers<[1], [1], [0], [0], [0, 0, 1, 0], [], []>} : vector<16x8xbf16>, vector<16x8xbf16>, vector<16x16xf32> -> vector<16x16xf32>
    %71 = arith.addf %70, %1 : vector<16x16xf32>
    %cst_23 = arith.constant dense<0xFF800000> : vector<16xf32>
    %72 = vector.multi_reduction <maximumf>, %71, %cst_23 [1] : vector<16x16xf32> to vector<16xf32>
    %73 = vector.shape_cast %72 : vector<16xf32> to vector<16x1xf32>
    %74 = vector.broadcast %73 : vector<16x1xf32> to vector<16x16xf32>
    %75 = arith.subf %71, %74 : vector<16x16xf32>
    %76 = math.exp %75 : vector<16x16xf32>
    %cst_24 = arith.constant dense<0.000000e+00> : vector<16xf32>
    %77 = vector.multi_reduction <add>, %76, %cst_24 [1] : vector<16x16xf32> to vector<16xf32>
    %78 = vector.shape_cast %77 : vector<16xf32> to vector<16x1xf32>
    %79 = tpu.reciprocal %78 {approx = true} : vector<16x1xf32> -> vector<16x1xf32>
    %80 = vector.broadcast %79 : vector<16x1xf32> to vector<16x16xf32>
    %81 = arith.mulf %76, %80 : vector<16x16xf32>
    %82 = arith.truncf %81 : vector<16x16xf32> to vector<16x16xbf16>
    %cst_25 = arith.constant dense<0.000000e+00> : vector<16x8xf32>
    %83 = tpu.matmul %82, %69, %cst_25 {dimension_numbers = #tpu.dot_dimension_numbers<[1], [0], [0], [1], [0, 0, 1, 1], [], []>} : vector<16x16xbf16>, vector<16x8xbf16>, vector<16x8xf32> -> vector<16x8xf32>
    %84 = vector.extract_strided_slice %41 {offsets = [0, 16], sizes = [16, 8], strides = [1, 1]} : vector<16x32xf32> to vector<16x8xf32>
    %85 = arith.truncf %84 : vector<16x8xf32> to vector<16x8xbf16>
    %86 = vector.extract_strided_slice %42 {offsets = [0, 16], sizes = [16, 8], strides = [1, 1]} : vector<16x32xf32> to vector<16x8xf32>
    %87 = arith.truncf %86 : vector<16x8xf32> to vector<16x8xbf16>
    %88 = vector.extract_strided_slice %43 {offsets = [0, 16], sizes = [16, 8], strides = [1, 1]} : vector<16x32xf32> to vector<16x8xf32>
    %89 = arith.truncf %88 : vector<16x8xf32> to vector<16x8xbf16>
    %cst_26 = arith.constant dense<0.000000e+00> : vector<16x16xf32>
    %90 = tpu.matmul %85, %87, %cst_26 {dimension_numbers = #tpu.dot_dimension_numbers<[1], [1], [0], [0], [0, 0, 1, 0], [], []>} : vector<16x8xbf16>, vector<16x8xbf16>, vector<16x16xf32> -> vector<16x16xf32>
    %91 = arith.addf %90, %1 : vector<16x16xf32>
    %cst_27 = arith.constant dense<0xFF800000> : vector<16xf32>
    %92 = vector.multi_reduction <maximumf>, %91, %cst_27 [1] : vector<16x16xf32> to vector<16xf32>
    %93 = vector.shape_cast %92 : vector<16xf32> to vector<16x1xf32>
    %94 = vector.broadcast %93 : vector<16x1xf32> to vector<16x16xf32>
    %95 = arith.subf %91, %94 : vector<16x16xf32>
    %96 = math.exp %95 : vector<16x16xf32>
    %cst_28 = arith.constant dense<0.000000e+00> : vector<16xf32>
    %97 = vector.multi_reduction <add>, %96, %cst_28 [1] : vector<16x16xf32> to vector<16xf32>
    %98 = vector.shape_cast %97 : vector<16xf32> to vector<16x1xf32>
    %99 = tpu.reciprocal %98 {approx = true} : vector<16x1xf32> -> vector<16x1xf32>
    %100 = vector.broadcast %99 : vector<16x1xf32> to vector<16x16xf32>
    %101 = arith.mulf %96, %100 : vector<16x16xf32>
    %102 = arith.truncf %101 : vector<16x16xf32> to vector<16x16xbf16>
    %cst_29 = arith.constant dense<0.000000e+00> : vector<16x8xf32>
    %103 = tpu.matmul %102, %89, %cst_29 {dimension_numbers = #tpu.dot_dimension_numbers<[1], [0], [0], [1], [0, 0, 1, 1], [], []>} : vector<16x16xbf16>, vector<16x8xbf16>, vector<16x8xf32> -> vector<16x8xf32>
    %104 = vector.extract_strided_slice %41 {offsets = [0, 24], sizes = [16, 8], strides = [1, 1]} : vector<16x32xf32> to vector<16x8xf32>
    %105 = arith.truncf %104 : vector<16x8xf32> to vector<16x8xbf16>
    %106 = vector.extract_strided_slice %42 {offsets = [0, 24], sizes = [16, 8], strides = [1, 1]} : vector<16x32xf32> to vector<16x8xf32>
    %107 = arith.truncf %106 : vector<16x8xf32> to vector<16x8xbf16>
    %108 = vector.extract_strided_slice %43 {offsets = [0, 24], sizes = [16, 8], strides = [1, 1]} : vector<16x32xf32> to vector<16x8xf32>
    %109 = arith.truncf %108 : vector<16x8xf32> to vector<16x8xbf16>
    %cst_30 = arith.constant dense<0.000000e+00> : vector<16x16xf32>
    %110 = tpu.matmul %105, %107, %cst_30 {dimension_numbers = #tpu.dot_dimension_numbers<[1], [1], [0], [0], [0, 0, 1, 0], [], []>} : vector<16x8xbf16>, vector<16x8xbf16>, vector<16x16xf32> -> vector<16x16xf32>
    %111 = arith.addf %110, %1 : vector<16x16xf32>
    %cst_31 = arith.constant dense<0xFF800000> : vector<16xf32>
    %112 = vector.multi_reduction <maximumf>, %111, %cst_31 [1] : vector<16x16xf32> to vector<16xf32>
    %113 = vector.shape_cast %112 : vector<16xf32> to vector<16x1xf32>
    %114 = vector.broadcast %113 : vector<16x1xf32> to vector<16x16xf32>
    %115 = arith.subf %111, %114 : vector<16x16xf32>
    %116 = math.exp %115 : vector<16x16xf32>
    %cst_32 = arith.constant dense<0.000000e+00> : vector<16xf32>
    %117 = vector.multi_reduction <add>, %116, %cst_32 [1] : vector<16x16xf32> to vector<16xf32>
    %118 = vector.shape_cast %117 : vector<16xf32> to vector<16x1xf32>
    %119 = tpu.reciprocal %118 {approx = true} : vector<16x1xf32> -> vector<16x1xf32>
    %120 = vector.broadcast %119 : vector<16x1xf32> to vector<16x16xf32>
    %121 = arith.mulf %116, %120 : vector<16x16xf32>
    %122 = arith.truncf %121 : vector<16x16xf32> to vector<16x16xbf16>
    %cst_33 = arith.constant dense<0.000000e+00> : vector<16x8xf32>
    %123 = tpu.matmul %122, %109, %cst_33 {dimension_numbers = #tpu.dot_dimension_numbers<[1], [0], [0], [1], [0, 0, 1, 1], [], []>} : vector<16x16xbf16>, vector<16x8xbf16>, vector<16x8xf32> -> vector<16x8xf32>
    %124 = tpu.concatenate %63, %83, %103, %123 in 1 : vector<16x8xf32>, vector<16x8xf32>, vector<16x8xf32>, vector<16x8xf32> -> vector<16x32xf32>
    %125 = arith.truncf %124 : vector<16x32xf32> to vector<16x32xbf16>
    %cst_34 = arith.constant dense<0.000000e+00> : vector<16x32xf32>
    %126 = tpu.matmul %125, %12, %cst_34 {dimension_numbers = #tpu.dot_dimension_numbers<[1], [0], [0], [1], [0, 0, 1, 1], [], []>} : vector<16x32xbf16>, vector<32x32xbf16>, vector<16x32xf32> -> vector<16x32xf32>
    %127 = arith.addf %0, %126 : vector<16x32xf32>
    %128 = vector.broadcast %8 : vector<1x32xf32> to vector<16x32xf32>
    %129 = arith.addf %127, %128 : vector<16x32xf32>
    %cst_35 = arith.constant dense<0.000000e+00> : vector<16xf32>
    %130 = vector.multi_reduction <add>, %129, %cst_35 [1] : vector<16x32xf32> to vector<16xf32>
    %131 = vector.shape_cast %130 : vector<16xf32> to vector<16x1xf32>
    %cst_36 = arith.constant 3.200000e+01 : f32
    %132 = vector.broadcast %cst_36 : f32 to vector<16x1xf32>
    %133 = arith.divf %131, %132 : vector<16x1xf32>
    %134 = vector.broadcast %133 : vector<16x1xf32> to vector<16x32xf32>
    %135 = arith.subf %129, %134 : vector<16x32xf32>
    %136 = arith.mulf %135, %135 : vector<16x32xf32>
    %cst_37 = arith.constant dense<0.000000e+00> : vector<16xf32>
    %137 = vector.multi_reduction <add>, %136, %cst_37 [1] : vector<16x32xf32> to vector<16xf32>
    %138 = vector.shape_cast %137 : vector<16xf32> to vector<16x1xf32>
    %cst_38 = arith.constant 3.200000e+01 : f32
    %139 = vector.broadcast %cst_38 : f32 to vector<16x1xf32>
    %140 = arith.divf %138, %139 : vector<16x1xf32>
    %141 = vector.broadcast %133 : vector<16x1xf32> to vector<16x32xf32>
    %142 = arith.subf %129, %141 : vector<16x32xf32>
    %cst_39 = arith.constant 9.99999974E-6 : f32
    %143 = vector.broadcast %cst_39 : f32 to vector<16x1xf32>
    %144 = arith.addf %140, %143 : vector<16x1xf32>
    %145 = math.rsqrt %144 : vector<16x1xf32>
    %146 = vector.broadcast %145 : vector<16x1xf32> to vector<16x32xf32>
    %147 = arith.mulf %142, %146 : vector<16x32xf32>
    %148 = vector.broadcast %5 : vector<1x32xf32> to vector<16x32xf32>
    %149 = arith.mulf %147, %148 : vector<16x32xf32>
    %150 = vector.broadcast %6 : vector<1x32xf32> to vector<16x32xf32>
    %151 = arith.addf %149, %150 : vector<16x32xf32>
    %152 = arith.truncf %151 : vector<16x32xf32> to vector<16x32xbf16>
    %cst_40 = arith.constant dense<0.000000e+00> : vector<16x64xf32>
    %153 = tpu.matmul %152, %13, %cst_40 {dimension_numbers = #tpu.dot_dimension_numbers<[1], [0], [0], [1], [0, 0, 1, 1], [], []>} : vector<16x32xbf16>, vector<32x64xbf16>, vector<16x64xf32> -> vector<16x64xf32>
    %154 = vector.broadcast %9 : vector<1x64xf32> to vector<16x64xf32>
    %155 = arith.addf %153, %154 : vector<16x64xf32>
    %cst_41 = arith.constant 0.000000e+00 : f32
    %156 = vector.broadcast %cst_41 : f32 to vector<16x64xf32>
    %157 = arith.maximumf %155, %156 : vector<16x64xf32>
    %158 = arith.truncf %157 : vector<16x64xf32> to vector<16x64xbf16>
    %cst_42 = arith.constant dense<0.000000e+00> : vector<16x32xf32>
    %159 = tpu.matmul %158, %14, %cst_42 {dimension_numbers = #tpu.dot_dimension_numbers<[1], [0], [0], [1], [0, 0, 1, 1], [], []>} : vector<16x64xbf16>, vector<64x32xbf16>, vector<16x32xf32> -> vector<16x32xf32>
    %160 = arith.addf %129, %159 : vector<16x32xf32>
    %161 = vector.broadcast %10 : vector<1x32xf32> to vector<16x32xf32>
    %162 = arith.addf %160, %161 : vector<16x32xf32>
    %cst_43 = arith.constant dense<0.000000e+00> : vector<16xf32>
    %163 = vector.multi_reduction <add>, %162, %cst_43 [1] : vector<16x32xf32> to vector<16xf32>
    %164 = vector.shape_cast %163 : vector<16xf32> to vector<16x1xf32>
    %cst_44 = arith.constant 3.200000e+01 : f32
    %165 = vector.broadcast %cst_44 : f32 to vector<16x1xf32>
    %166 = arith.divf %164, %165 : vector<16x1xf32>
    %167 = vector.broadcast %166 : vector<16x1xf32> to vector<16x32xf32>
    %168 = arith.subf %162, %167 : vector<16x32xf32>
    %169 = arith.mulf %168, %168 : vector<16x32xf32>
    %cst_45 = arith.constant dense<0.000000e+00> : vector<16xf32>
    %170 = vector.multi_reduction <add>, %169, %cst_45 [1] : vector<16x32xf32> to vector<16xf32>
    %171 = vector.shape_cast %170 : vector<16xf32> to vector<16x1xf32>
    %cst_46 = arith.constant 3.200000e+01 : f32
    %172 = vector.broadcast %cst_46 : f32 to vector<16x1xf32>
    %173 = arith.divf %171, %172 : vector<16x1xf32>
    %174 = vector.broadcast %166 : vector<16x1xf32> to vector<16x32xf32>
    %175 = arith.subf %162, %174 : vector<16x32xf32>
    %cst_47 = arith.constant 9.99999974E-6 : f32
    %176 = vector.broadcast %cst_47 : f32 to vector<16x1xf32>
    %177 = arith.addf %173, %176 : vector<16x1xf32>
    %178 = math.rsqrt %177 : vector<16x1xf32>
    %179 = vector.broadcast %178 : vector<16x1xf32> to vector<16x32xf32>
    %180 = arith.mulf %175, %179 : vector<16x32xf32>
    %181 = vector.broadcast %3 : vector<1x32xf32> to vector<16x32xf32>
    %182 = arith.mulf %180, %181 : vector<16x32xf32>
    %183 = vector.broadcast %4 : vector<1x32xf32> to vector<16x32xf32>
    %184 = arith.addf %182, %183 : vector<16x32xf32>
    %185 = arith.truncf %184 : vector<16x32xf32> to vector<16x32xbf16>
    %cst_48 = arith.constant dense<0.000000e+00> : vector<16x96xf32>
    %186 = tpu.matmul %185, %11, %cst_48 {dimension_numbers = #tpu.dot_dimension_numbers<[1], [0], [0], [1], [0, 0, 1, 1], [], []>} : vector<16x32xbf16>, vector<32x96xbf16>, vector<16x96xf32> -> vector<16x96xf32>
    %187 = vector.broadcast %7 : vector<1x96xf32> to vector<16x96xf32>
    %188 = arith.addf %186, %187 : vector<16x96xf32>
    %189 = vector.extract_strided_slice %188 {offsets = [0, 0], sizes = [16, 32], strides = [1, 1]} : vector<16x96xf32> to vector<16x32xf32>
    %190 = vector.extract_strided_slice %188 {offsets = [0, 32], sizes = [16, 32], strides = [1, 1]} : vector<16x96xf32> to vector<16x32xf32>
    %191 = vector.extract_strided_slice %188 {offsets = [0, 64], sizes = [16, 32], strides = [1, 1]} : vector<16x96xf32> to vector<16x32xf32>
    %192 = vector.extract_strided_slice %189 {offsets = [0, 0], sizes = [16, 8], strides = [1, 1]} : vector<16x32xf32> to vector<16x8xf32>
    %193 = arith.truncf %192 : vector<16x8xf32> to vector<16x8xbf16>
    %194 = vector.extract_strided_slice %190 {offsets = [0, 0], sizes = [16, 8], strides = [1, 1]} : vector<16x32xf32> to vector<16x8xf32>
    %195 = arith.truncf %194 : vector<16x8xf32> to vector<16x8xbf16>
    %196 = vector.extract_strided_slice %191 {offsets = [0, 0], sizes = [16, 8], strides = [1, 1]} : vector<16x32xf32> to vector<16x8xf32>
    %197 = arith.truncf %196 : vector<16x8xf32> to vector<16x8xbf16>
    %cst_49 = arith.constant dense<0.000000e+00> : vector<16x16xf32>
    %198 = tpu.matmul %193, %195, %cst_49 {dimension_numbers = #tpu.dot_dimension_numbers<[1], [1], [0], [0], [0, 0, 1, 0], [], []>} : vector<16x8xbf16>, vector<16x8xbf16>, vector<16x16xf32> -> vector<16x16xf32>
    %199 = arith.addf %198, %1 : vector<16x16xf32>
    %cst_50 = arith.constant dense<0xFF800000> : vector<16xf32>
    %200 = vector.multi_reduction <maximumf>, %199, %cst_50 [1] : vector<16x16xf32> to vector<16xf32>
    %201 = vector.shape_cast %200 : vector<16xf32> to vector<16x1xf32>
    %202 = vector.broadcast %201 : vector<16x1xf32> to vector<16x16xf32>
    %203 = arith.subf %199, %202 : vector<16x16xf32>
    %204 = math.exp %203 : vector<16x16xf32>
    %cst_51 = arith.constant dense<0.000000e+00> : vector<16xf32>
    %205 = vector.multi_reduction <add>, %204, %cst_51 [1] : vector<16x16xf32> to vector<16xf32>
    %206 = vector.shape_cast %205 : vector<16xf32> to vector<16x1xf32>
    %207 = tpu.reciprocal %206 {approx = true} : vector<16x1xf32> -> vector<16x1xf32>
    %208 = vector.broadcast %207 : vector<16x1xf32> to vector<16x16xf32>
    %209 = arith.mulf %204, %208 : vector<16x16xf32>
    %210 = arith.truncf %209 : vector<16x16xf32> to vector<16x16xbf16>
    %cst_52 = arith.constant dense<0.000000e+00> : vector<16x8xf32>
    %211 = tpu.matmul %210, %197, %cst_52 {dimension_numbers = #tpu.dot_dimension_numbers<[1], [0], [0], [1], [0, 0, 1, 1], [], []>} : vector<16x16xbf16>, vector<16x8xbf16>, vector<16x8xf32> -> vector<16x8xf32>
    %212 = vector.extract_strided_slice %189 {offsets = [0, 8], sizes = [16, 8], strides = [1, 1]} : vector<16x32xf32> to vector<16x8xf32>
    %213 = arith.truncf %212 : vector<16x8xf32> to vector<16x8xbf16>
    %214 = vector.extract_strided_slice %190 {offsets = [0, 8], sizes = [16, 8], strides = [1, 1]} : vector<16x32xf32> to vector<16x8xf32>
    %215 = arith.truncf %214 : vector<16x8xf32> to vector<16x8xbf16>
    %216 = vector.extract_strided_slice %191 {offsets = [0, 8], sizes = [16, 8], strides = [1, 1]} : vector<16x32xf32> to vector<16x8xf32>
    %217 = arith.truncf %216 : vector<16x8xf32> to vector<16x8xbf16>
    %cst_53 = arith.constant dense<0.000000e+00> : vector<16x16xf32>
    %218 = tpu.matmul %213, %215, %cst_53 {dimension_numbers = #tpu.dot_dimension_numbers<[1], [1], [0], [0], [0, 0, 1, 0], [], []>} : vector<16x8xbf16>, vector<16x8xbf16>, vector<16x16xf32> -> vector<16x16xf32>
    %219 = arith.addf %218, %1 : vector<16x16xf32>
    %cst_54 = arith.constant dense<0xFF800000> : vector<16xf32>
    %220 = vector.multi_reduction <maximumf>, %219, %cst_54 [1] : vector<16x16xf32> to vector<16xf32>
    %221 = vector.shape_cast %220 : vector<16xf32> to vector<16x1xf32>
    %222 = vector.broadcast %221 : vector<16x1xf32> to vector<16x16xf32>
    %223 = arith.subf %219, %222 : vector<16x16xf32>
    %224 = math.exp %223 : vector<16x16xf32>
    %cst_55 = arith.constant dense<0.000000e+00> : vector<16xf32>
    %225 = vector.multi_reduction <add>, %224, %cst_55 [1] : vector<16x16xf32> to vector<16xf32>
    %226 = vector.shape_cast %225 : vector<16xf32> to vector<16x1xf32>
    %227 = tpu.reciprocal %226 {approx = true} : vector<16x1xf32> -> vector<16x1xf32>
    %228 = vector.broadcast %227 : vector<16x1xf32> to vector<16x16xf32>
    %229 = arith.mulf %224, %228 : vector<16x16xf32>
    %230 = arith.truncf %229 : vector<16x16xf32> to vector<16x16xbf16>
    %cst_56 = arith.constant dense<0.000000e+00> : vector<16x8xf32>
    %231 = tpu.matmul %230, %217, %cst_56 {dimension_numbers = #tpu.dot_dimension_numbers<[1], [0], [0], [1], [0, 0, 1, 1], [], []>} : vector<16x16xbf16>, vector<16x8xbf16>, vector<16x8xf32> -> vector<16x8xf32>
    %232 = vector.extract_strided_slice %189 {offsets = [0, 16], sizes = [16, 8], strides = [1, 1]} : vector<16x32xf32> to vector<16x8xf32>
    %233 = arith.truncf %232 : vector<16x8xf32> to vector<16x8xbf16>
    %234 = vector.extract_strided_slice %190 {offsets = [0, 16], sizes = [16, 8], strides = [1, 1]} : vector<16x32xf32> to vector<16x8xf32>
    %235 = arith.truncf %234 : vector<16x8xf32> to vector<16x8xbf16>
    %236 = vector.extract_strided_slice %191 {offsets = [0, 16], sizes = [16, 8], strides = [1, 1]} : vector<16x32xf32> to vector<16x8xf32>
    %237 = arith.truncf %236 : vector<16x8xf32> to vector<16x8xbf16>
    %cst_57 = arith.constant dense<0.000000e+00> : vector<16x16xf32>
    %238 = tpu.matmul %233, %235, %cst_57 {dimension_numbers = #tpu.dot_dimension_numbers<[1], [1], [0], [0], [0, 0, 1, 0], [], []>} : vector<16x8xbf16>, vector<16x8xbf16>, vector<16x16xf32> -> vector<16x16xf32>
    %239 = arith.addf %238, %1 : vector<16x16xf32>
    %cst_58 = arith.constant dense<0xFF800000> : vector<16xf32>
    %240 = vector.multi_reduction <maximumf>, %239, %cst_58 [1] : vector<16x16xf32> to vector<16xf32>
    %241 = vector.shape_cast %240 : vector<16xf32> to vector<16x1xf32>
    %242 = vector.broadcast %241 : vector<16x1xf32> to vector<16x16xf32>
    %243 = arith.subf %239, %242 : vector<16x16xf32>
    %244 = math.exp %243 : vector<16x16xf32>
    %cst_59 = arith.constant dense<0.000000e+00> : vector<16xf32>
    %245 = vector.multi_reduction <add>, %244, %cst_59 [1] : vector<16x16xf32> to vector<16xf32>
    %246 = vector.shape_cast %245 : vector<16xf32> to vector<16x1xf32>
    %247 = tpu.reciprocal %246 {approx = true} : vector<16x1xf32> -> vector<16x1xf32>
    %248 = vector.broadcast %247 : vector<16x1xf32> to vector<16x16xf32>
    %249 = arith.mulf %244, %248 : vector<16x16xf32>
    %250 = arith.truncf %249 : vector<16x16xf32> to vector<16x16xbf16>
    %cst_60 = arith.constant dense<0.000000e+00> : vector<16x8xf32>
    %251 = tpu.matmul %250, %237, %cst_60 {dimension_numbers = #tpu.dot_dimension_numbers<[1], [0], [0], [1], [0, 0, 1, 1], [], []>} : vector<16x16xbf16>, vector<16x8xbf16>, vector<16x8xf32> -> vector<16x8xf32>
    %252 = vector.extract_strided_slice %189 {offsets = [0, 24], sizes = [16, 8], strides = [1, 1]} : vector<16x32xf32> to vector<16x8xf32>
    %253 = arith.truncf %252 : vector<16x8xf32> to vector<16x8xbf16>
    %254 = vector.extract_strided_slice %190 {offsets = [0, 24], sizes = [16, 8], strides = [1, 1]} : vector<16x32xf32> to vector<16x8xf32>
    %255 = arith.truncf %254 : vector<16x8xf32> to vector<16x8xbf16>
    %256 = vector.extract_strided_slice %191 {offsets = [0, 24], sizes = [16, 8], strides = [1, 1]} : vector<16x32xf32> to vector<16x8xf32>
    %257 = arith.truncf %256 : vector<16x8xf32> to vector<16x8xbf16>
    %cst_61 = arith.constant dense<0.000000e+00> : vector<16x16xf32>
    %258 = tpu.matmul %253, %255, %cst_61 {dimension_numbers = #tpu.dot_dimension_numbers<[1], [1], [0], [0], [0, 0, 1, 0], [], []>} : vector<16x8xbf16>, vector<16x8xbf16>, vector<16x16xf32> -> vector<16x16xf32>
    %259 = arith.addf %258, %1 : vector<16x16xf32>
    %cst_62 = arith.constant dense<0xFF800000> : vector<16xf32>
    %260 = vector.multi_reduction <maximumf>, %259, %cst_62 [1] : vector<16x16xf32> to vector<16xf32>
    %261 = vector.shape_cast %260 : vector<16xf32> to vector<16x1xf32>
    %262 = vector.broadcast %261 : vector<16x1xf32> to vector<16x16xf32>
    %263 = arith.subf %259, %262 : vector<16x16xf32>
    %264 = math.exp %263 : vector<16x16xf32>
    %cst_63 = arith.constant dense<0.000000e+00> : vector<16xf32>
    %265 = vector.multi_reduction <add>, %264, %cst_63 [1] : vector<16x16xf32> to vector<16xf32>
    %266 = vector.shape_cast %265 : vector<16xf32> to vector<16x1xf32>
    %267 = tpu.reciprocal %266 {approx = true} : vector<16x1xf32> -> vector<16x1xf32>
    %268 = vector.broadcast %267 : vector<16x1xf32> to vector<16x16xf32>
    %269 = arith.mulf %264, %268 : vector<16x16xf32>
    %270 = arith.truncf %269 : vector<16x16xf32> to vector<16x16xbf16>
    %cst_64 = arith.constant dense<0.000000e+00> : vector<16x8xf32>
    %271 = tpu.matmul %270, %257, %cst_64 {dimension_numbers = #tpu.dot_dimension_numbers<[1], [0], [0], [1], [0, 0, 1, 1], [], []>} : vector<16x16xbf16>, vector<16x8xbf16>, vector<16x8xf32> -> vector<16x8xf32>
    %272 = tpu.concatenate %211, %231, %251, %271 in 1 : vector<16x8xf32>, vector<16x8xf32>, vector<16x8xf32>, vector<16x8xf32> -> vector<16x32xf32>
    %273 = arith.truncf %272 : vector<16x32xf32> to vector<16x32xbf16>
    %cst_65 = arith.constant dense<0.000000e+00> : vector<16x32xf32>
    %274 = tpu.matmul %273, %12, %cst_65 {dimension_numbers = #tpu.dot_dimension_numbers<[1], [0], [0], [1], [0, 0, 1, 1], [], []>} : vector<16x32xbf16>, vector<32x32xbf16>, vector<16x32xf32> -> vector<16x32xf32>
    %275 = arith.addf %162, %274 : vector<16x32xf32>
    %276 = vector.broadcast %8 : vector<1x32xf32> to vector<16x32xf32>
    %277 = arith.addf %275, %276 : vector<16x32xf32>
    %cst_66 = arith.constant dense<0.000000e+00> : vector<16xf32>
    %278 = vector.multi_reduction <add>, %277, %cst_66 [1] : vector<16x32xf32> to vector<16xf32>
    %279 = vector.shape_cast %278 : vector<16xf32> to vector<16x1xf32>
    %cst_67 = arith.constant 3.200000e+01 : f32
    %280 = vector.broadcast %cst_67 : f32 to vector<16x1xf32>
    %281 = arith.divf %279, %280 : vector<16x1xf32>
    %282 = vector.broadcast %281 : vector<16x1xf32> to vector<16x32xf32>
    %283 = arith.subf %277, %282 : vector<16x32xf32>
    %284 = arith.mulf %283, %283 : vector<16x32xf32>
    %cst_68 = arith.constant dense<0.000000e+00> : vector<16xf32>
    %285 = vector.multi_reduction <add>, %284, %cst_68 [1] : vector<16x32xf32> to vector<16xf32>
    %286 = vector.shape_cast %285 : vector<16xf32> to vector<16x1xf32>
    %cst_69 = arith.constant 3.200000e+01 : f32
    %287 = vector.broadcast %cst_69 : f32 to vector<16x1xf32>
    %288 = arith.divf %286, %287 : vector<16x1xf32>
    %289 = vector.broadcast %281 : vector<16x1xf32> to vector<16x32xf32>
    %290 = arith.subf %277, %289 : vector<16x32xf32>
    %cst_70 = arith.constant 9.99999974E-6 : f32
    %291 = vector.broadcast %cst_70 : f32 to vector<16x1xf32>
    %292 = arith.addf %288, %291 : vector<16x1xf32>
    %293 = math.rsqrt %292 : vector<16x1xf32>
    %294 = vector.broadcast %293 : vector<16x1xf32> to vector<16x32xf32>
    %295 = arith.mulf %290, %294 : vector<16x32xf32>
    %296 = vector.broadcast %5 : vector<1x32xf32> to vector<16x32xf32>
    %297 = arith.mulf %295, %296 : vector<16x32xf32>
    %298 = vector.broadcast %6 : vector<1x32xf32> to vector<16x32xf32>
    %299 = arith.addf %297, %298 : vector<16x32xf32>
    %300 = arith.truncf %299 : vector<16x32xf32> to vector<16x32xbf16>
    %cst_71 = arith.constant dense<0.000000e+00> : vector<16x64xf32>
    %301 = tpu.matmul %300, %13, %cst_71 {dimension_numbers = #tpu.dot_dimension_numbers<[1], [0], [0], [1], [0, 0, 1, 1], [], []>} : vector<16x32xbf16>, vector<32x64xbf16>, vector<16x64xf32> -> vector<16x64xf32>
    %302 = vector.broadcast %9 : vector<1x64xf32> to vector<16x64xf32>
    %303 = arith.addf %301, %302 : vector<16x64xf32>
    %cst_72 = arith.constant 0.000000e+00 : f32
    %304 = vector.broadcast %cst_72 : f32 to vector<16x64xf32>
    %305 = arith.maximumf %303, %304 : vector<16x64xf32>
    %306 = arith.truncf %305 : vector<16x64xf32> to vector<16x64xbf16>
    %cst_73 = arith.constant dense<0.000000e+00> : vector<16x32xf32>
    %307 = tpu.matmul %306, %14, %cst_73 {dimension_numbers = #tpu.dot_dimension_numbers<[1], [0], [0], [1], [0, 0, 1, 1], [], []>} : vector<16x64xbf16>, vector<64x32xbf16>, vector<16x32xf32> -> vector<16x32xf32>
    %308 = arith.addf %277, %307 : vector<16x32xf32>
    %309 = vector.broadcast %10 : vector<1x32xf32> to vector<16x32xf32>
    %310 = arith.addf %308, %309 : vector<16x32xf32>
    %c0_74 = arith.constant 0 : index
    %c0_75 = arith.constant 0 : index
    %311 = vector.load %arg7[%c0_74, %c0_75] : memref<16x32xf32, #tpu.memory_space<vmem>>, vector<16x32xf32>
    tpu.vector_store %arg7[%c0_74, %c0_75], %310 {strides = array<i32>} : memref<16x32xf32, #tpu.memory_space<vmem>>, vector<16x32xf32>,
    return
  }
}

</mosaic_0001>

<bundles_post_ra>
// kernel: encoder_forward.1
= control target key start
LH: loop header
LB: loop body
LE: loop exit
PB: predicated region body
PF: predicated region fallthrough
CT: control target
= control target key end

     0   :  { %vm53_vm0 = vcmask 261120   ;;  %s2618_s0 = inlined_call_operand.vmem [shape: f32[16,32], index: 0, kind: input, shape index: {}]   ;;  %s2619_s1 = inlined_call_operand.vmem [shape: f32[16,16], index: 1, kind: input, shape index: {}]   ;;  %s2620_s2 = inlined_call_operand.vmem [shape: f32[8,128], index: 2, kind: input, shape index: {}]   ;;  %s2621_s3 = inlined_call_operand.vmem [shape: bf16[32,96], index: 3, kind: input, shape index: {}]   ;;  %s2622_s4 = inlined_call_operand.vmem [shape: bf16[32,32], index: 4, kind: input, shape index: {}]   ;;  %s2623_s5 = inlined_call_operand.vmem [shape: bf16[32,64], index: 5, kind: input, shape index: {}]   ;;  %s2624_s6 = inlined_call_operand.vmem [shape: bf16[64,32], index: 6, kind: input, shape index: {}]   ;;  %s2625_s7 = inlined_call_operand.hbm [shape: f32[16,32], index: 7, kind: output, shape index: {}]  }
   0x1   :  { %v2180_v0 = vld [vmem:[%s2618_s0] sm:$0xff]  ;;  %v2185_v1 = vld [vmem:[%s2618_s0 + $0x8] sm:$0xff] }
   0x2   :  { %v54_v2 = vsel %vm53_vm0, %v2180_v0, 0.0  ;;  %v57_v3 = vsel %vm53_vm0, %v2185_v1, 0.0 }
   0x3   :  { %55 = vadd.xlane.f32.xlu0 %v54_v2 }
   0x7   :  { %58 = vadd.xlane.f32.xlu0 %v57_v3 }
   0x8   :  { %12 = vsyncpa [#allocation3], 0  ;;  %v2198_v14 = vld [vmem:[%s2621_s3 + $0x8] sm:$0xff]   ;;  %v2119_v15 = vmov 0.0   ;;  %vm2120_vm1 = vmmov 0   ;;  %v2207_v16 = vld [vmem:[%s2621_s3] sm:$0xff]   ;;  %v81_v23 = vlaneseq }
   0x9   :  { %1791 = vmatprep.subr.bf16.mxu1 %v2119_v15  ;;  %1795 = vmatprep.mubr.msk.bf16.mxu1 %vm2120_vm1, %v2119_v15  ;;  %v2221_v26 = vld [vmem:[%s2620_s2] sm:$0xff]  ;;  %s2121_s2 = smov 88   ;;  %s2122_s9 = smov 96   ;;  %vm158_vm2 = vcmask 64512   ;;  %vm206_vm3 = vcmask 130048   ;;  %v2289_v63 = vld [vmem:[%s2619_s1 + $0x8] sm:$0xff] }
   0xa   :  { %1792 = vmatpush3.bf16.msra.mxu1 %v2198_v14  ;;  %1805 = vmatprep.subr.bf16.mxu0 %v2119_v15  ;;  %v2215_v24 = vshrl.u32 %v81_v23, 7  ;;  %s2123_s10 = smov 120   ;;  %s2124_s11 = smov 112   ;;  %v2283_v59 = vld [vmem:[%s2619_s1] sm:$0xff]  ;;  %vm668_vm4 = vcmask 195584   ;;  %vm862_vm5 = vcmask 523264  }
   0xb   :  { %1793 = vmatprep.subr.bf16.mxu1 %v2119_v15  ;;  %1807 = vmatprep.mubr.msk.bf16.mxu0 %vm2120_vm1, %v2119_v15  ;;  %s2125_s12 = smov 80   ;;  %s2126_s13 = smov 104  }
   0xc   :  { %v83_v25 = vsub.s32 0, %v2215_v24  ;;  %v89_v30 = vsub.s32 1, %v2215_v24  ;;  %v96_v39 = vsub.s32 4, %v2215_v24  ;;  %s2127_s14 = smov 72   ;;  %s2128_s1 = smov 64  }
   0xd   :  { %s2129_s19 = smov 48   ;;  %s2130_s20 = smov 40  }
   0xe   :  { %1794 = vmatpush3.bf16.msra.mxu1 %v2207_v16  ;;  %v2224_v29 = vrot.slane %v2221_v26, %v83_v25  ;;  %v2229_v34 = vrot.slane %v2221_v26, %v89_v30  ;;  %v2239_v41 = vrot.slane %v2221_v26, %v96_v39  ;;  %s2131_s21 = smov 56   ;;  %s2132_s24 = smov 8  }
   0xf   :  { %1799 = vmatprep.subr.bf16.mxu1 %v2119_v15  ;;  %s2133_s27 = smov 16   ;;  %s2134_s0 = smov 24  }
  0x8c   :  { %v56_v4 = vpop.xlane.xlu0 %55 }
  0x8d   :  { %v61_v5 = vmul.f32 0.03125, %v56_v4 }
  0x8f   :  { %v63_v6 = vsub.f32 %v2180_v0, %v61_v5 }
  0x90   :  { %v59_v7 = vpop.xlane.xlu0 %58 }
  0x91   :  { %v62_v8 = vmul.f32 0.03125, %v59_v7  ;;  %v65_v9 = vmul.f32 %v63_v6, %v63_v6 }
  0x93   :  { %v64_v10 = vsub.f32 %v2185_v1, %v62_v8  ;;  %v67_v11 = vsel %vm53_vm0, %v65_v9, 0.0 }
  0x94   :  { %68 = vadd.xlane.f32.xlu1 %v67_v11 }
  0x95   :  { %v66_v12 = vmul.f32 %v64_v10, %v64_v10 }
  0x97   :  { %v70_v13 = vsel %vm53_vm0, %v66_v12, 0.0 }
  0x98   :  { %71 = vadd.xlane.f32.xlu1 %v70_v13 }
 0x11d   :  { %v69_v17 = vpop.xlane.xlu1 %68 }
 0x11e   :  { %v73_v18 = vmul.f32 0.03125, %v69_v17 }
 0x120   :  { %v75_v19 = vadd.f32 1e-05, %v73_v18 }
 0x121   :  { %v72_v20 = vpop.xlane.xlu1 %71 }
 0x122   :  { %2017 = vrsqrt.f32 %v75_v19  ;;  %v74_v21 = vmul.f32 0.03125, %v72_v20 }
 0x124   :  { %v76_v22 = vadd.f32 1e-05, %v74_v21 }
 0x126   :  { %2019 = vrsqrt.f32 %v76_v22 }
 0x12f   :  { %v2018_v27 = vpop.eup %2017 }
 0x130   :  { %v79_v28 = vmul.f32 %v2018_v27, %v63_v6 }
 0x132   :  { %v85_v33 = vmul.f32 %v2224_v29, %v79_v28 }
 0x133   :  { %v2020_v31 = vpop.eup %2019 }
 0x134   :  { %v80_v32 = vmul.f32 %v2020_v31, %v64_v10  ;;  %v91_v36 = vadd.f32 %v2229_v34, %v85_v33 }
 0x136   :  { %v86_v35 = vmul.f32 %v2224_v29, %v80_v32 }
 0x138   :  { %v92_v37 = vadd.f32 %v2229_v34, %v86_v35 }
 0x13a   :  { %v93_v38 = vpack.c.bf16 %v92_v37, %v91_v36 }
 0x13c   :  { %1796 = vmatmul.mubr.msk.bf16.vlgmr.msra.gmra.mxu1 %vm53_vm0, %v93_v38 }
 0x13d   :  { %1801 = vmatprep.mubr.msk.bf16.mxu1 %vm2120_vm1, %v2119_v15 }
 0x1fc   :  { %v147_v40 = vpop.f32.mrf.mxu1 }
 0x1fd   :  { %v148_v44 = vadd.f32 %v147_v40, %v2239_v41 }
 0x1fe   :  { %v1797_v42 = vpop.f32.mrf.mxu1 }
 0x200   :  { %v150_v43 = vpop.f32.mrf.mxu1 }
 0x201   :  { %v151_v45 = vadd.f32 %v150_v43, %v2239_v41 }
 0x202   :  { %v1798_v46 = vpop.f32.mrf.mxu1 }
 0x203   :  { %v2243_v47 = vpack.c.bf16 %v151_v45, %v148_v44 }
 0x205   :  { %279 = vrot.lane.b32.xlu1 %v2243_v47, %s2121_s2  ;;  %156 = vrot.lane.b32.xlu0 %v2243_v47, %s2122_s9 }
 0x209   :  { %277 = vrot.lane.b32.xlu1 %v2243_v47, %s2123_s10  ;;  %398 = vrot.lane.b32.xlu0 %v2243_v47, %s2124_s11 }
 0x20d   :  { %400 = vrot.lane.b32.xlu1 %v2243_v47, %s2125_s12  ;;  %519 = vrot.lane.b32.xlu0 %v2243_v47, %s2126_s13 }
 0x211   :  { %521 = vrot.lane.b32.xlu1 %v2243_v47, %s2127_s14 }
 0x277   :  { %v157_v48 = vpop.permute.xlu0 %156  ;;  %v280_v50 = vpop.permute.xlu1 %279 }
 0x278   :  { %v163_v49 = vsel %vm158_vm2, %v157_v48, 0  ;;  %v285_v52 = vsel %vm158_vm2, %v280_v50, 0 }
 0x279   :  { %1800 = vmatpush3.bf16.xpose.msra.mxu1 %v163_v49 }
 0x27a   :  { %1811 = vmatprep.subr.bf16.mxu1 %v2119_v15 }
 0x27b   :  { %v278_v51 = vpop.permute.xlu1 %277  ;;  %v399_v56 = vpop.permute.xlu0 %398 }
 0x27f   :  { %v401_v53 = vpop.permute.xlu1 %400  ;;  %v520_v58 = vpop.permute.xlu0 %519 }
 0x280   :  { %1802 = vmatmul.mubr.msk.bf16.vlgmr.msra.gmra.mxu1 %vm158_vm2, %v2243_v47  ;;  %v406_v54 = vsel %vm158_vm2, %v401_v53, 0 }
 0x281   :  { %1812 = vmatpush3.bf16.xpose.msra.mxu1 %v285_v52  ;;  %1813 = vmatprep.mubr.msk.bf16.mxu1 %vm2120_vm1, %v2119_v15 }
 0x282   :  { %1823 = vmatprep.subr.bf16.mxu1 %v2119_v15 }
 0x283   :  { %v522_v55 = vpop.permute.xlu1 %521 }
 0x284   :  { %v527_v57 = vsel %vm158_vm2, %v522_v55, 0 }
 0x288   :  { %1814 = vmatmul.mubr.msk.bf16.vlgmr.msra.gmra.mxu1 %vm158_vm2, %v278_v51 }
 0x289   :  { %1824 = vmatpush3.bf16.xpose.msra.mxu1 %v406_v54  ;;  %1825 = vmatprep.mubr.msk.bf16.mxu1 %vm2120_vm1, %v2119_v15 }
 0x28a   :  { %1835 = vmatprep.subr.bf16.mxu1 %v2119_v15 }
 0x290   :  { %1826 = vmatmul.mubr.msk.bf16.vlgmr.msra.gmra.mxu1 %vm158_vm2, %v399_v56 }
 0x291   :  { %1836 = vmatpush3.bf16.xpose.msra.mxu1 %v527_v57  ;;  %1837 = vmatprep.mubr.msk.bf16.mxu1 %vm2120_vm1, %v2119_v15 }
 0x292   :  { %1847 = vmatprep.subr.bf16.mxu1 %v2119_v15 }
 0x298   :  { %1838 = vmatmul.mubr.msk.bf16.vlgmr.msra.gmra.mxu1 %vm158_vm2, %v520_v58 }
 0x299   :  { %1851 = vmatprep.mubr.msk.bf16.mxu1 %vm2120_vm1, %v2119_v15 }
 0x340   :  { %v199_v60 = vpop.f32.mrf.mxu1 }
 0x341   :  { %v200_v61 = vadd.f32 %v199_v60, %v2283_v59 }
 0x342   :  { %v1803_v62 = vpop.f32.mrf.mxu1 }
 0x343   :  { %v207_v2 = vsel %vm206_vm3, %v200_v61, -inf }
 0x344   :  { %208 = vmax.xlane.f32.xlu1 %v207_v2  ;;  %v202_v3 = vpop.f32.mrf.mxu1 }
 0x345   :  { %v203_v4 = vadd.f32 %v202_v3, %v2289_v63 }
 0x346   :  { %v1804_v5 = vpop.f32.mrf.mxu1 }
 0x347   :  { %v210_v6 = vsel %vm206_vm3, %v203_v4, -inf }
 0x348   :  { %211 = vmax.xlane.f32.xlu0 %v210_v6  ;;  %v321_v7 = vpop.f32.mrf.mxu1 }
 0x349   :  { %v322_v8 = vadd.f32 %v321_v7, %v2283_v59 }
 0x34a   :  { %v1815_v9 = vpop.f32.mrf.mxu1 }
 0x34b   :  { %v328_v10 = vsel %vm206_vm3, %v322_v8, -inf }
 0x34c   :  { %329 = vmax.xlane.f32.xlu0 %v328_v10  ;;  %v324_v11 = vpop.f32.mrf.mxu1 }
 0x34d   :  { %v325_v12 = vadd.f32 %v324_v11, %v2289_v63 }
 0x34e   :  { %v1816_v13 = vpop.f32.mrf.mxu1 }
 0x34f   :  { %v331_v17 = vsel %vm206_vm3, %v325_v12, -inf }
 0x350   :  { %332 = vmax.xlane.f32.xlu0 %v331_v17  ;;  %v442_v18 = vpop.f32.mrf.mxu1 }
 0x351   :  { %v443_v19 = vadd.f32 %v442_v18, %v2283_v59 }
 0x352   :  { %v1827_v20 = vpop.f32.mrf.mxu1 }
 0x353   :  { %v449_v21 = vsel %vm206_vm3, %v443_v19, -inf }
 0x354   :  { %450 = vmax.xlane.f32.xlu1 %v449_v21  ;;  %v445_v22 = vpop.f32.mrf.mxu1 }
 0x355   :  { %v446_v23 = vadd.f32 %v445_v22, %v2289_v63 }
 0x356   :  { %v1828_v25 = vpop.f32.mrf.mxu1 }
 0x357   :  { %v452_v27 = vsel %vm206_vm3, %v446_v23, -inf }
 0x358   :  { %453 = vmax.xlane.f32.xlu0 %v452_v27  ;;  %v563_v28 = vpop.f32.mrf.mxu1 }
 0x359   :  { %v564_v30 = vadd.f32 %v563_v28, %v2283_v59 }
 0x35a   :  { %v1839_v31 = vpop.f32.mrf.mxu1 }
 0x35b   :  { %v570_v32 = vsel %vm206_vm3, %v564_v30, -inf }
 0x35c   :  { %571 = vmax.xlane.f32.xlu1 %v570_v32  ;;  %v566_v33 = vpop.f32.mrf.mxu1 }
 0x35d   :  { %v567_v35 = vadd.f32 %v566_v33, %v2289_v63 }
 0x35e   :  { %v1840_v36 = vpop.f32.mrf.mxu1 }
 0x35f   :  { %v573_v37 = vsel %vm206_vm3, %v567_v35, -inf }
 0x360   :  { %574 = vmax.xlane.f32.xlu0 %v573_v37 }
 0x36d   :  { %230 = vrot.lane.b32.xlu1 %v2243_v47, %s2128_s1 }
 0x3cd   :  { %v209_v38 = vpop.xlane.xlu1 %208 }
 0x3ce   :  { %v213_v39 = vsub.f32 %v200_v61, %v209_v38 }
 0x3d0   :  { %v215_v40 = vmul.f32 1.442695, %v213_v39 }
 0x3d1   :  { %v212_v42 = vpop.xlane.xlu0 %211 }
 0x3d2   :  { %2021 = vpow2.f32 %v215_v40  ;;  %v214_v43 = vsub.f32 %v203_v4, %v212_v42 }
 0x3d4   :  { %v217_v44 = vmul.f32 1.442695, %v214_v43 }
 0x3d5   :  { %v330_v45 = vpop.xlane.xlu0 %329 }
 0x3d6   :  { %2023 = vpow2.f32 %v217_v44  ;;  %v334_v46 = vsub.f32 %v322_v8, %v330_v45 }
 0x3d8   :  { %v336_v48 = vmul.f32 1.442695, %v334_v46 }
 0x3d9   :  { %v333_v49 = vpop.xlane.xlu0 %332 }
 0x3da   :  { %2025 = vpow2.f32 %v336_v48  ;;  %v335_v50 = vsub.f32 %v325_v12, %v333_v49 }
 0x3dc   :  { %v338_v51 = vmul.f32 1.442695, %v335_v50 }
 0x3dd   :  { %v451_v52 = vpop.xlane.xlu1 %450 }
 0x3de   :  { %2027 = vpow2.f32 %v338_v51  ;;  %v455_v53 = vsub.f32 %v443_v19, %v451_v52 }
 0x3df   :  { %v2022_v54 = vpop.eup %2021 }
 0x3e0   :  { %v457_v55 = vmul.f32 1.442695, %v455_v53  ;;  %v219_v56 = vsel %vm206_vm3, %v2022_v54, 0.0 }
 0x3e1   :  { %v454_v57 = vpop.xlane.xlu0 %453  ;;  %220 = vadd.xlane.f32.xlu1 %v219_v56 }
 0x3e2   :  { %2029 = vpow2.f32 %v457_v55  ;;  %v456_v58 = vsub.f32 %v446_v23, %v454_v57 }
 0x3e3   :  { %v2024_v60 = vpop.eup %2023 }
 0x3e4   :  { %v459_v61 = vmul.f32 1.442695, %v456_v58  ;;  %v222_v62 = vsel %vm206_vm3, %v2024_v60, 0.0 }
 0x3e5   :  { %v572_v2 = vpop.xlane.xlu1 %571  ;;  %223 = vadd.xlane.f32.xlu0 %v222_v62 }
 0x3e6   :  { %2031 = vpow2.f32 %v459_v61  ;;  %v576_v3 = vsub.f32 %v564_v30, %v572_v2 }
 0x3e7   :  { %v2026_v4 = vpop.eup %2025 }
 0x3e8   :  { %v578_v5 = vmul.f32 1.442695, %v576_v3  ;;  %v340_v6 = vsel %vm206_vm3, %v2026_v4, 0.0 }
 0x3e9   :  { %341 = vadd.xlane.f32.xlu1 %v340_v6  ;;  %v231_v7 = vpop.permute.xlu1 %230  ;;  %v575_v8 = vpop.xlane.xlu0 %574 }
 0x3ea   :  { %2033 = vpow2.f32 %v578_v5  ;;  %v577_v9 = vsub.f32 %v567_v35, %v575_v8  ;;  %1806 = vmatpush3.bf16.msra.mxu0 %v231_v7  ;;  %v2341_v7 = vld [vmem:[%s2622_s4 + $0x8] sm:$0xff]  }
 0x3eb   :  { %v2028_v10 = vpop.eup %2027  ;;  %1817 = vmatprep.subr.bf16.mxu0 %v2119_v15  ;;  %1848 = vmatpush3.bf16.msra.mxu1 %v2341_v7 }
 0x3ec   :  { %v580_v11 = vmul.f32 1.442695, %v577_v9  ;;  %v343_v12 = vsel %vm206_vm3, %v2028_v10, 0.0  ;;  %1849 = vmatprep.subr.bf16.mxu1 %v2119_v15 }
 0x3ed   :  { %344 = vadd.xlane.f32.xlu0 %v343_v12  ;;  %v2349_v12 = vld [vmem:[%s2622_s4] sm:$0xff]  }
 0x3ee   :  { %2035 = vpow2.f32 %v580_v11 }
 0x3ef   :  { %v2030_v13 = vpop.eup %2029  ;;  %1850 = vmatpush3.bf16.msra.mxu1 %v2349_v12 }
 0x3f0   :  { %v461_v17 = vsel %vm206_vm3, %v2030_v13, 0.0  ;;  %1863 = vmatprep.subr.bf16.mxu1 %v2119_v15 }
 0x3f1   :  { %462 = vadd.xlane.f32.xlu1 %v461_v17 }
 0x3f3   :  { %v2032_v18 = vpop.eup %2031 }
 0x3f4   :  { %v464_v19 = vsel %vm206_vm3, %v2032_v18, 0.0 }
 0x3f5   :  { %465 = vadd.xlane.f32.xlu0 %v464_v19 }
 0x3f7   :  { %v2034_v20 = vpop.eup %2033 }
 0x3f8   :  { %v582_v21 = vsel %vm206_vm3, %v2034_v20, 0.0 }
 0x3f9   :  { %583 = vadd.xlane.f32.xlu1 %v582_v21 }
 0x3fb   :  { %v2036_v22 = vpop.eup %2035 }
 0x3fc   :  { %v585_v23 = vsel %vm206_vm3, %v2036_v22, 0.0 }
 0x3fd   :  { %586 = vadd.xlane.f32.xlu0 %v585_v23 }
 0x40a   :  { %472 = vrot.lane.b32.xlu1 %v2243_v47, %s2129_s19 }
 0x40e   :  { %593 = vrot.lane.b32.xlu1 %v2243_v47, %s2130_s20 }
 0x413   :  { %351 = vrot.lane.b32.xlu0 %v2243_v47, %s2131_s21 }
 0x46a   :  { %v221_v25 = vpop.xlane.xlu1 %220 }
 0x46b   :  { %2037 = vrcp.f32 %v221_v25 }
 0x46e   :  { %v224_v27 = vpop.xlane.xlu0 %223 }
 0x46f   :  { %2039 = vrcp.f32 %v224_v27 }
 0x472   :  { %v342_v30 = vpop.xlane.xlu1 %341 }
 0x476   :  { %v345_v28 = vpop.xlane.xlu0 %344 }
 0x477   :  { %2041 = vrcp.f32 %v345_v28 }
 0x478   :  { %v2038_v31 = vpop.eup %2037  ;;  %2043 = vrcp.f32 %v342_v30 }
 0x479   :  { %v227_v33 = vmul.f32 %v2038_v31, %v2022_v54 }
 0x47a   :  { %v463_v37 = vpop.xlane.xlu1 %462 }
 0x47c   :  { %v2040_v32 = vpop.eup %2039 }
 0x47d   :  { %v228_v35 = vmul.f32 %v2040_v32, %v2024_v60 }
 0x47e   :  { %v466_v36 = vpop.xlane.xlu0 %465 }
 0x47f   :  { %v229_v38 = vpack.c.bf16 %v228_v35, %v227_v33  ;;  %2045 = vrcp.f32 %v466_v36 }
 0x480   :  { %2047 = vrcp.f32 %v463_v37 }
 0x481   :  { %1808 = vmatmul.mubr.msk.bf16.vlgmr.msra.gmra.mxu0 %vm206_vm3, %v229_v38 }
 0x482   :  { %1819 = vmatprep.mubr.msk.bf16.mxu0 %vm2120_vm1, %v2119_v15  ;;  %v584_v42 = vpop.xlane.xlu1 %583 }
 0x484   :  { %v2042_v47 = vpop.eup %2041 }
 0x485   :  { %v2044_v40 = vpop.eup %2043  ;;  %v349_v43 = vmul.f32 %v2042_v47, %v2028_v10 }
 0x486   :  { %v587_v39 = vpop.xlane.xlu0 %586  ;;  %v348_v45 = vmul.f32 %v2044_v40, %v2026_v4  ;;  %v473_v49 = vpop.permute.xlu1 %472 }
 0x487   :  { %2049 = vrcp.f32 %v587_v39 }
 0x488   :  { %2051 = vrcp.f32 %v584_v42  ;;  %v350_v46 = vpack.c.bf16 %v349_v43, %v348_v45 }
 0x48a   :  { %v352_v44 = vpop.permute.xlu0 %351  ;;  %v594_v55 = vpop.permute.xlu1 %593 }
 0x48b   :  { %1818 = vmatpush3.bf16.msra.mxu0 %v352_v44  ;;  %v732_v44 = vsub.s32 5, %v2215_v24 }
 0x48c   :  { %1829 = vmatprep.subr.bf16.mxu0 %v2119_v15  ;;  %v2046_v48 = vpop.eup %2045 }
 0x48d   :  { %v2048_v50 = vpop.eup %2047  ;;  %v470_v51 = vmul.f32 %v2046_v48, %v2032_v18  ;;  %v2366_v45 = vrot.slane %v2221_v26, %v732_v44 }
 0x48e   :  { %1820 = vmatmul.mubr.msk.bf16.vlgmr.msra.gmra.mxu0 %vm206_vm3, %v350_v46  ;;  %v469_v52 = vmul.f32 %v2048_v50, %v2030_v13 }
 0x48f   :  { %1830 = vmatpush3.bf16.msra.mxu0 %v473_v49  ;;  %1831 = vmatprep.mubr.msk.bf16.mxu0 %vm2120_vm1, %v2119_v15 }
 0x490   :  { %1841 = vmatprep.subr.bf16.mxu0 %v2119_v15  ;;  %v471_v53 = vpack.c.bf16 %v470_v51, %v469_v52 }
 0x494   :  { %v2050_v54 = vpop.eup %2049 }
 0x495   :  { %v2052_v56 = vpop.eup %2051  ;;  %v591_v57 = vmul.f32 %v2050_v54, %v2036_v22 }
 0x496   :  { %1832 = vmatmul.mubr.msk.bf16.vlgmr.msra.gmra.mxu0 %vm206_vm3, %v471_v53  ;;  %v590_v58 = vmul.f32 %v2052_v56, %v2034_v20 }
 0x497   :  { %1842 = vmatpush3.bf16.msra.mxu0 %v594_v55  ;;  %1843 = vmatprep.mubr.msk.bf16.mxu0 %vm2120_vm1, %v2119_v15 }
 0x498   :  { %1855 = vmatprep.subr.bf16.mxu0 %v2119_v15  ;;  %v592_v60 = vpack.c.bf16 %v591_v57, %v590_v58 }
 0x49e   :  { %1844 = vmatmul.mubr.msk.bf16.vlgmr.msra.gmra.mxu0 %vm206_vm3, %v592_v60 }
 0x49f   :  { %1859 = vmatprep.mubr.msk.bf16.mxu0 %vm2120_vm1, %v2119_v15 }
 0x541   :  { %v270_v61 = vpop.f32.mrf.mxu0 }
 0x543   :  { %v1809_v62 = vpop.f32.mrf.mxu0 }
 0x545   :  { %v273_v2 = vpop.f32.mrf.mxu0 }
 0x547   :  { %v1810_v3 = vpop.f32.mrf.mxu0 }
 0x54e   :  { %v391_v4 = vpop.f32.mrf.mxu0 }
 0x550   :  { %v1821_v5 = vpop.f32.mrf.mxu0 }
 0x551   :  { %v2387_v5 = vld [vmem:[%s2623_s5 + $0x8] sm:$0xff]  }
 0x552   :  { %v394_v6 = vpop.f32.mrf.mxu0  ;;  %1856 = vmatpush3.bf16.msra.mxu0 %v2387_v5 }
 0x553   :  { %v1977_v8 = vpack.i.bf16 %v394_v6, %v391_v4  ;;  %v2393_v6 = vld [vmem:[%s2623_s5] sm:$0xff]   ;;  %1857 = vmatprep.subr.bf16.mxu0 %v2119_v15 }
 0x554   :  { %v1822_v9 = vpop.f32.mrf.mxu0 }
 0x555   :  { %1978 = vrot.lane.b32.xlu1 %v1977_v8, %s2132_s24  ;;  %v2401_v8 = vld [vmem:[%s2624_s6 + $0x18] sm:$0xff]  }
 0x556   :  { %v512_v10 = vpop.f32.mrf.mxu0  ;;  %1858 = vmatpush3.bf16.msra.mxu0 %v2393_v6 }
 0x557   :  { %1875 = vmatprep.subr.bf16.mxu0 %v2119_v15 }
 0x558   :  { %v1833_v11 = vpop.f32.mrf.mxu0 }
 0x55a   :  { %v515_v13 = vpop.f32.mrf.mxu0 }
 0x55b   :  { %v1982_v17 = vpack.i.bf16 %v515_v13, %v512_v10 }
 0x55c   :  { %v1834_v18 = vpop.f32.mrf.mxu0 }
 0x55d   :  { %1983 = vrot.lane.b32.xlu0 %v1982_v17, %s2133_s27 }
 0x55e   :  { %v633_v19 = vpop.f32.mrf.mxu0 }
 0x560   :  { %v1845_v20 = vpop.f32.mrf.mxu0 }
 0x562   :  { %v636_v21 = vpop.f32.mrf.mxu0 }
 0x563   :  { %v1987_v22 = vpack.i.bf16 %v636_v21, %v633_v19  ;;  %v764_v19 = vsub.s32 2, %v2215_v24 }
 0x564   :  { %v1846_v23 = vpop.f32.mrf.mxu0 }
 0x565   :  { %1988 = vrot.lane.b32.xlu1 %v1987_v22, %s2134_s0  ;;  %v2407_v22 = vrot.slane %v2221_v26, %v764_v19  ;;  %v770_v23 = vsub.s32 3, %v2215_v24 }
 0x5c7   :  { %v1979_v25 = vpop.permute.xlu1 %1978 }
 0x5c8   :  { %v1981_v28 = vunpack.i.h.bf16 %v1979_v25  ;;  %v1980_v30 = vunpack.i.l.bf16 %v1979_v25 }
 0x5ca   :  { %v665_v35 = vsel %vm158_vm2, %v273_v2, %v1981_v28  ;;  %v664_v36 = vsel %vm158_vm2, %v270_v61, %v1980_v30  ;;  %v2412_v30 = vrot.slane %v2221_v26, %v770_v23 }
 0x5cf   :  { %v1984_v27 = vpop.permute.xlu0 %1983 }
 0x5d0   :  { %v1986_v31 = vunpack.i.h.bf16 %v1984_v27  ;;  %v1985_v32 = vunpack.i.l.bf16 %v1984_v27 }
 0x5d2   :  { %v667_v47 = vsel %vm206_vm3, %v665_v35, %v1986_v31  ;;  %v666_v39 = vsel %vm206_vm3, %v664_v36, %v1985_v32  ;;  %v2427_v36 = vld [vmem:[%s2624_s6 + $0x10] sm:$0xff]  }
 0x5d7   :  { %v1989_v33 = vpop.permute.xlu1 %1988 }
 0x5d8   :  { %v1991_v37 = vunpack.i.h.bf16 %v1989_v33  ;;  %v1990_v38 = vunpack.i.l.bf16 %v1989_v33 }
 0x5da   :  { %v670_v40 = vsel %vm668_vm4, %v667_v47, %v1991_v37  ;;  %v669_v42 = vsel %vm668_vm4, %v666_v39, %v1990_v38  ;;  %v777_v37 = vsub.s32 6, %v2215_v24 }
 0x5db   :  { %v671_v43 = vpack.c.bf16 %v670_v40, %v669_v42 }
 0x5dc   :  { %v2447_v38 = vrot.slane %v2221_v26, %v777_v37 }
 0x5dd   :  { %1852 = vmatmul.mubr.msk.bf16.vlgmr.msra.gmra.mxu1 %vm53_vm0, %v671_v43 }
 0x5de   :  { %1871 = vmatprep.mubr.msk.bf16.mxu1 %vm2120_vm1, %v2119_v15  ;;  %1864 = vmatpush3.bf16.msra.mxu1 %v2401_v8 }
 0x5df   :  { %1865 = vmatprep.subr.bf16.mxu1 %v2119_v15 }
 0x5e2   :  { %1866 = vmatpush3.bf16.msra.mxu1 %v2427_v36 }
 0x5e3   :  { %1867 = vmatprep.subr.bf16.mxu1 %v2119_v15 }
 0x69d   :  { %v721_v46 = vpop.f32.mrf.mxu1 }
 0x69e   :  { %v728_v48 = vadd.f32 %v721_v46, %v2180_v0 }
 0x69f   :  { %v1853_v49 = vpop.f32.mrf.mxu1 }
 0x6a0   :  { %v2370_v50 = vadd.f32 %v2366_v45, %v728_v48 }
 0x6a1   :  { %v724_v51 = vpop.f32.mrf.mxu1 }
 0x6a2   :  { %v729_v52 = vadd.f32 %v724_v51, %v2185_v1  ;;  %v736_v53 = vsel %vm53_vm0, %v2370_v50, 0.0  ;;  %v911_v51 = vsub.s32 7, %v2215_v24 }
 0x6a3   :  { %737 = vadd.xlane.f32.xlu0 %v736_v53  ;;  %v1854_v54 = vpop.f32.mrf.mxu1 }
 0x6a4   :  { %v2376_v55 = vadd.f32 %v2366_v45, %v729_v52  ;;  %v2456_v52 = vrot.slane %v2221_v26, %v911_v51 }
 0x6a6   :  { %v739_v56 = vsel %vm53_vm0, %v2376_v55, 0.0 }
 0x6a7   :  { %740 = vadd.xlane.f32.xlu1 %v739_v56 }
 0x72c   :  { %v738_v0 = vpop.xlane.xlu0 %737 }
 0x72d   :  { %v742_v57 = vmul.f32 0.03125, %v738_v0 }
 0x72f   :  { %v744_v58 = vsub.f32 %v2370_v50, %v742_v57 }
 0x730   :  { %v741_v60 = vpop.xlane.xlu1 %740 }
 0x731   :  { %v743_v61 = vmul.f32 0.03125, %v741_v60  ;;  %v746_v62 = vmul.f32 %v744_v58, %v744_v58 }
 0x733   :  { %v745_v1 = vsub.f32 %v2376_v55, %v743_v61  ;;  %v748_v2 = vsel %vm53_vm0, %v746_v62, 0.0 }
 0x734   :  { %749 = vadd.xlane.f32.xlu0 %v748_v2 }
 0x735   :  { %v747_v3 = vmul.f32 %v745_v1, %v745_v1 }
 0x737   :  { %v751_v4 = vsel %vm53_vm0, %v747_v3, 0.0 }
 0x738   :  { %752 = vadd.xlane.f32.xlu0 %v751_v4 }
 0x7bd   :  { %v750_v9 = vpop.xlane.xlu0 %749 }
 0x7be   :  { %v754_v10 = vmul.f32 0.03125, %v750_v9 }
 0x7c0   :  { %v756_v11 = vadd.f32 1e-05, %v754_v10 }
 0x7c1   :  { %v753_v13 = vpop.xlane.xlu0 %752 }
 0x7c2   :  { %2053 = vrsqrt.f32 %v756_v11  ;;  %v755_v17 = vmul.f32 0.03125, %v753_v13 }
 0x7c4   :  { %v757_v18 = vadd.f32 1e-05, %v755_v17 }
 0x7c6   :  { %2055 = vrsqrt.f32 %v757_v18 }
 0x7cf   :  { %v2054_v20 = vpop.eup %2053 }
 0x7d0   :  { %v760_v21 = vmul.f32 %v2054_v20, %v744_v58 }
 0x7d2   :  { %v766_v28 = vmul.f32 %v2407_v22, %v760_v21 }
 0x7d3   :  { %v2056_v25 = vpop.eup %2055 }
 0x7d4   :  { %v761_v27 = vmul.f32 %v2056_v25, %v745_v1  ;;  %v772_v32 = vadd.f32 %v2412_v30, %v766_v28 }
 0x7d6   :  { %v767_v31 = vmul.f32 %v2407_v22, %v761_v27 }
 0x7d8   :  { %v773_v33 = vadd.f32 %v2412_v30, %v767_v31 }
 0x7da   :  { %v774_v35 = vpack.c.bf16 %v773_v33, %v772_v32 }
 0x7dc   :  { %1860 = vmatmul.mubr.msk.bf16.vlgmr.msra.gmra.mxu0 %vm53_vm0, %v774_v35 }
 0x7dd   :  { %1876 = vmatpush3.bf16.msra.mxu0 %v2198_v14  ;;  %1879 = vmatprep.mubr.msk.bf16.mxu0 %vm2120_vm1, %v2119_v15  ;;  %v2434_v14 = vld [vmem:[%s2624_s6 + $0x8] sm:$0xff]  }
 0x7de   :  { %1877 = vmatprep.subr.bf16.mxu0 %v2119_v15  ;;  %1868 = vmatpush3.bf16.msra.mxu1 %v2434_v14 }
 0x7df   :  { %1869 = vmatprep.subr.bf16.mxu1 %v2119_v15 }
 0x7e1   :  { %1878 = vmatpush3.bf16.msra.mxu0 %v2207_v16  ;;  %v2441_v16 = vld [vmem:[%s2624_s6] sm:$0xff]   ;;  %s2135_s6 = smov [#allocation2]  }
 0x7e2   :  { %1883 = vmatprep.subr.bf16.mxu0 %v2119_v15  ;;  %1870 = vmatpush3.bf16.msra.mxu1 %v2441_v16 }
 0x7e3   :  { %1889 = vmatprep.subr.bf16.mxu1 %v2119_v15 }
 0x89c   :  { %v828_v47 = vpop.f32.mrf.mxu0 }
 0x89d   :  { %v829_v40 = vadd.f32 %v828_v47, %v2447_v38 }
 0x89e   :  { %v1861_v39 = vpop.f32.mrf.mxu0 }
 0x89f   :  { %v835_v46 = vmax.f32 %v829_v40, 0.0 }
 0x8a0   :  { %v831_v42 = vpop.f32.mrf.mxu0 }
 0x8a1   :  { %v832_v43 = vadd.f32 %v831_v42, %v2447_v38 }
 0x8a2   :  { %v1862_v44 = vpop.f32.mrf.mxu0 }
 0x8a3   :  { %v836_v48 = vmax.f32 %v832_v43, 0.0 }
 0x8a5   :  { %v837_v49 = vpack.c.bf16 %v836_v48, %v835_v46 }
 0x8a7   :  { %1872 = vmatmul.mubr.msk.bf16.vlgmr.msra.gmra.mxu1 %vm862_vm5, %v837_v49 }
 0x8a8   :  { %1891 = vmatprep.mubr.msk.bf16.mxu1 %vm2120_vm1, %v2119_v15 }
 0x967   :  { %v900_v53 = vpop.f32.mrf.mxu1 }
 0x968   :  { %v907_v54 = vadd.f32 %v900_v53, %v2370_v50 }
 0x969   :  { %v1873_v56 = vpop.f32.mrf.mxu1 }
 0x96a   :  { %v2460_v0 = vadd.f32 %v2456_v52, %v907_v54 }
 0x96b   :  { %v903_v57 = vpop.f32.mrf.mxu1 }
 0x96c   :  { %v908_v58 = vadd.f32 %v903_v57, %v2376_v55  ;;  %v915_v60 = vsel %vm53_vm0, %v2460_v0, 0.0 }
 0x96d   :  { %916 = vadd.xlane.f32.xlu0 %v915_v60  ;;  %v1874_v61 = vpop.f32.mrf.mxu1 }
 0x96e   :  { %v2466_v24 = vadd.f32 %v2456_v52, %v908_v58 }
 0x970   :  { %v918_v26 = vsel %vm53_vm0, %v2466_v24, 0.0 }
 0x971   :  { %919 = vadd.xlane.f32.xlu1 %v918_v26 }
 0x9f6   :  { %v917_v50 = vpop.xlane.xlu0 %916 }
 0x9f7   :  { %v921_v62 = vmul.f32 0.03125, %v917_v50 }
 0x9f9   :  { %v923_v1 = vsub.f32 %v2460_v0, %v921_v62 }
 0x9fa   :  { %v920_v2 = vpop.xlane.xlu1 %919 }
 0x9fb   :  { %v922_v3 = vmul.f32 0.03125, %v920_v2  ;;  %v925_v4 = vmul.f32 %v923_v1, %v923_v1 }
 0x9fd   :  { %v924_v55 = vsub.f32 %v2466_v24, %v922_v3  ;;  %v927_v9 = vsel %vm53_vm0, %v925_v4, 0.0 }
 0x9fe   :  { %928 = vadd.xlane.f32.xlu0 %v927_v9 }
 0x9ff   :  { %v926_v10 = vmul.f32 %v924_v55, %v924_v55 }
 0xa01   :  { %v930_v11 = vsel %vm53_vm0, %v926_v10, 0.0 }
 0xa02   :  { %931 = vadd.xlane.f32.xlu1 %v930_v11 }
 0xa87   :  { %v929_v13 = vpop.xlane.xlu0 %928 }
 0xa88   :  { %v933_v17 = vmul.f32 0.03125, %v929_v13 }
 0xa8a   :  { %v935_v18 = vadd.f32 1e-05, %v933_v17 }
 0xa8b   :  { %v932_v19 = vpop.xlane.xlu1 %931 }
 0xa8c   :  { %2057 = vrsqrt.f32 %v935_v18  ;;  %v934_v20 = vmul.f32 0.03125, %v932_v19 }
 0xa8e   :  { %v936_v21 = vadd.f32 1e-05, %v934_v20 }
 0xa90   :  { %2059 = vrsqrt.f32 %v936_v21 }
 0xa99   :  { %v2058_v23 = vpop.eup %2057 }
 0xa9a   :  { %v939_v25 = vmul.f32 %v2058_v23, %v923_v1 }
 0xa9c   :  { %v941_v31 = vmul.f32 %v939_v25, %v2224_v29 }
 0xa9d   :  { %v2060_v27 = vpop.eup %2059 }
 0xa9e   :  { %v940_v28 = vmul.f32 %v2060_v27, %v924_v55  ;;  %v943_v33 = vadd.f32 %v941_v31, %v2229_v34 }
 0xaa0   :  { %v942_v32 = vmul.f32 %v940_v28, %v2224_v29 }
 0xaa2   :  { %v944_v35 = vadd.f32 %v942_v32, %v2229_v34 }
 0xaa4   :  { %v945_v37 = vpack.c.bf16 %v944_v35, %v943_v33 }
 0xaa6   :  { %1880 = vmatmul.mubr.msk.bf16.vlgmr.msra.gmra.mxu0 %vm53_vm0, %v945_v37 }
 0xaa7   :  { %1885 = vmatprep.mubr.msk.bf16.mxu0 %vm2120_vm1, %v2119_v15 }
 0xb66   :  { %v983_v47 = vpop.f32.mrf.mxu0 }
 0xb67   :  { %v984_v42 = vadd.f32 %v983_v47, %v2239_v41 }
 0xb68   :  { %v1881_v39 = vpop.f32.mrf.mxu0 }
 0xb6a   :  { %v986_v40 = vpop.f32.mrf.mxu0 }
 0xb6b   :  { %v987_v43 = vadd.f32 %v986_v40, %v2239_v41 }
 0xb6c   :  { %v1882_v44 = vpop.f32.mrf.mxu0 }
 0xb6d   :  { %v2483_v46 = vpack.c.bf16 %v987_v43, %v984_v42 }
 0xb6f   :  { %1113 = vrot.lane.b32.xlu1 %v2483_v46, %s2121_s2  ;;  %992 = vrot.lane.b32.xlu0 %v2483_v46, %s2122_s9  ;;  %s1686_s2 = sshll.u32 %s2135_s6, 4  ;;  %s1687_s2 = int_to_ptr.vmem [resolvable:$true] %s1686_s2 }
 0xb70   :  { %s2097_s9 = scalar_lea.vmem %s1687_s2, 256  ;;  %p2102_p1 = scmp.lt.s32.totalorder %s1687_s2, %s1687_s2 }
 0xb71   :  { %p2098_p0 = scmp.ne.s32.totalorder %s1687_s2, %s2097_s9  ;;  %p2103_p2 = scmp.lt.s32.totalorder %s2097_s9, %s2097_s9 }
 0xb73   :  { %1111 = vrot.lane.b32.xlu1 %v2483_v46, %s2123_s10  ;;  %1232 = vrot.lane.b32.xlu0 %v2483_v46, %s2124_s11  ;;  %p2104_p3 = por %p2103_p2, %p2102_p1 }
 0xb75   :  { %p2105_p4 = pnand %p2104_p3, %p2098_p0 }
 0xb77   :  { %1234 = vrot.lane.b32.xlu1 %v2483_v46, %s2125_s12  ;;  %1353 = vrot.lane.b32.xlu0 %v2483_v46, %s2126_s13 }
 0xb7b   :  { %1355 = vrot.lane.b32.xlu1 %v2483_v46, %s2127_s14 }
 0xbe1   :  { %v993_v29 = vpop.permute.xlu0 %992  ;;  %v1114_v41 = vpop.permute.xlu1 %1113 }
 0xbe2   :  { %v998_v34 = vsel %vm158_vm2, %v993_v29, 0  ;;  %v1119_v49 = vsel %vm158_vm2, %v1114_v41, 0 }
 0xbe3   :  { %1884 = vmatpush3.bf16.xpose.msra.mxu0 %v998_v34 }
 0xbe4   :  { %1895 = vmatprep.subr.bf16.mxu0 %v2119_v15 }
 0xbe5   :  { %v1112_v48 = vpop.permute.xlu1 %1111  ;;  %v1233_v56 = vpop.permute.xlu0 %1232 }
 0xbe9   :  { %v1235_v51 = vpop.permute.xlu1 %1234  ;;  %v1354_v58 = vpop.permute.xlu0 %1353 }
 0xbea   :  { %1886 = vmatmul.mubr.msk.bf16.vlgmr.msra.gmra.mxu0 %vm158_vm2, %v2483_v46  ;;  %v1240_v53 = vsel %vm158_vm2, %v1235_v51, 0 }
 0xbeb   :  { %1896 = vmatpush3.bf16.xpose.msra.mxu0 %v1119_v49  ;;  %1897 = vmatprep.mubr.msk.bf16.mxu0 %vm2120_vm1, %v2119_v15 }
 0xbec   :  { %1907 = vmatprep.subr.bf16.mxu0 %v2119_v15 }
 0xbed   :  { %v1356_v54 = vpop.permute.xlu1 %1355 }
 0xbee   :  { %v1361_v57 = vsel %vm158_vm2, %v1356_v54, 0 }
 0xbf2   :  { %1898 = vmatmul.mubr.msk.bf16.vlgmr.msra.gmra.mxu0 %vm158_vm2, %v1112_v48 }
 0xbf3   :  { %1908 = vmatpush3.bf16.xpose.msra.mxu0 %v1240_v53  ;;  %1909 = vmatprep.mubr.msk.bf16.mxu0 %vm2120_vm1, %v2119_v15 }
 0xbf4   :  { %1919 = vmatprep.subr.bf16.mxu0 %v2119_v15 }
 0xbfa   :  { %1910 = vmatmul.mubr.msk.bf16.vlgmr.msra.gmra.mxu0 %vm158_vm2, %v1233_v56 }
 0xbfb   :  { %1920 = vmatpush3.bf16.xpose.msra.mxu0 %v1361_v57  ;;  %1921 = vmatprep.mubr.msk.bf16.mxu0 %vm2120_vm1, %v2119_v15 }
 0xbfc   :  { %1931 = vmatprep.subr.bf16.mxu0 %v2119_v15 }
 0xc02   :  { %1922 = vmatmul.mubr.msk.bf16.vlgmr.msra.gmra.mxu0 %vm158_vm2, %v1354_v58 }
 0xc03   :  { %1932 = vmatpush3.bf16.msra.mxu0 %v2341_v7  ;;  %1935 = vmatprep.mubr.msk.bf16.mxu0 %vm2120_vm1, %v2119_v15 }
 0xc04   :  { %1933 = vmatprep.subr.bf16.mxu0 %v2119_v15 }
 0xc07   :  { %1934 = vmatpush3.bf16.msra.mxu0 %v2349_v12 }
 0xc08   :  { %1947 = vmatprep.subr.bf16.mxu0 %v2119_v15 }
 0xcaa   :  { %v1034_v60 = vpop.f32.mrf.mxu0 }
 0xcab   :  { %v1035_v61 = vadd.f32 %v1034_v60, %v2283_v59 }
 0xcac   :  { %v1887_v26 = vpop.f32.mrf.mxu0 }
 0xcad   :  { %v1041_v50 = vsel %vm206_vm3, %v1035_v61, -inf }
 0xcae   :  { %1042 = vmax.xlane.f32.xlu1 %v1041_v50  ;;  %v1037_v62 = vpop.f32.mrf.mxu0 }
 0xcaf   :  { %v1038_v1 = vadd.f32 %v1037_v62, %v2289_v63 }
 0xcb0   :  { %v1888_v7 = vpop.f32.mrf.mxu0 }
 0xcb1   :  { %v1044_v2 = vsel %vm206_vm3, %v1038_v1, -inf }
 0xcb2   :  { %1045 = vmax.xlane.f32.xlu0 %v1044_v2  ;;  %v1155_v3 = vpop.f32.mrf.mxu0 }
 0xcb3   :  { %v1156_v4 = vadd.f32 %v1155_v3, %v2283_v59 }
 0xcb4   :  { %v1899_v12 = vpop.f32.mrf.mxu0 }
 0xcb5   :  { %v1162_v55 = vsel %vm206_vm3, %v1156_v4, -inf }
 0xcb6   :  { %1163 = vmax.xlane.f32.xlu0 %v1162_v55  ;;  %v1158_v9 = vpop.f32.mrf.mxu0 }
 0xcb7   :  { %v1159_v10 = vadd.f32 %v1158_v9, %v2289_v63 }
 0xcb8   :  { %v1900_v11 = vpop.f32.mrf.mxu0 }
 0xcb9   :  { %v1165_v13 = vsel %vm206_vm3, %v1159_v10, -inf }
 0xcba   :  { %1166 = vmax.xlane.f32.xlu0 %v1165_v13  ;;  %v1276_v17 = vpop.f32.mrf.mxu0 }
 0xcbb   :  { %v1277_v18 = vadd.f32 %v1276_v17, %v2283_v59 }
 0xcbc   :  { %v1911_v19 = vpop.f32.mrf.mxu0 }
 0xcbd   :  { %v1283_v20 = vsel %vm206_vm3, %v1277_v18, -inf }
 0xcbe   :  { %1284 = vmax.xlane.f32.xlu1 %v1283_v20  ;;  %v1279_v21 = vpop.f32.mrf.mxu0 }
 0xcbf   :  { %v1280_v23 = vadd.f32 %v1279_v21, %v2289_v63 }
 0xcc0   :  { %v1912_v25 = vpop.f32.mrf.mxu0 }
 0xcc1   :  { %v1286_v27 = vsel %vm206_vm3, %v1280_v23, -inf }
 0xcc2   :  { %1287 = vmax.xlane.f32.xlu0 %v1286_v27  ;;  %v1397_v28 = vpop.f32.mrf.mxu0 }
 0xcc3   :  { %v1398_v31 = vadd.f32 %v1397_v28, %v2283_v59 }
 0xcc4   :  { %v1923_v32 = vpop.f32.mrf.mxu0 }
 0xcc5   :  { %v1404_v33 = vsel %vm206_vm3, %v1398_v31, -inf }
 0xcc6   :  { %1405 = vmax.xlane.f32.xlu1 %v1404_v33  ;;  %v1400_v35 = vpop.f32.mrf.mxu0 }
 0xcc7   :  { %v1401_v37 = vadd.f32 %v1400_v35, %v2289_v63 }
 0xcc8   :  { %v1924_v47 = vpop.f32.mrf.mxu0 }
 0xcc9   :  { %v1407_v39 = vsel %vm206_vm3, %v1401_v37, -inf }
 0xcca   :  { %1408 = vmax.xlane.f32.xlu0 %v1407_v39 }
 0xcd7   :  { %1064 = vrot.lane.b32.xlu1 %v2483_v46, %s2128_s1 }
 0xd37   :  { %v1043_v40 = vpop.xlane.xlu1 %1042 }
 0xd38   :  { %v1047_v42 = vsub.f32 %v1035_v61, %v1043_v40 }
 0xd3a   :  { %v1049_v43 = vmul.f32 1.442695, %v1047_v42 }
 0xd3b   :  { %v1046_v44 = vpop.xlane.xlu0 %1045 }
 0xd3c   :  { %2061 = vpow2.f32 %v1049_v43  ;;  %v1048_v59 = vsub.f32 %v1038_v1, %v1046_v44 }
 0xd3e   :  { %v1051_v29 = vmul.f32 1.442695, %v1048_v59 }
 0xd3f   :  { %v1164_v34 = vpop.xlane.xlu0 %1163 }
 0xd40   :  { %2063 = vpow2.f32 %v1051_v29  ;;  %v1168_v41 = vsub.f32 %v1156_v4, %v1164_v34 }
 0xd42   :  { %v1170_v48 = vmul.f32 1.442695, %v1168_v41 }
 0xd43   :  { %v1167_v49 = vpop.xlane.xlu0 %1166 }
 0xd44   :  { %2065 = vpow2.f32 %v1170_v48  ;;  %v1169_v63 = vsub.f32 %v1159_v10, %v1167_v49 }
 0xd46   :  { %v1172_v51 = vmul.f32 1.442695, %v1169_v63 }
 0xd47   :  { %v1285_v53 = vpop.xlane.xlu1 %1284 }
 0xd48   :  { %2067 = vpow2.f32 %v1172_v51  ;;  %v1289_v54 = vsub.f32 %v1277_v18, %v1285_v53 }
 0xd49   :  { %v2062_v56 = vpop.eup %2061 }
 0xd4a   :  { %v1291_v57 = vmul.f32 1.442695, %v1289_v54  ;;  %v1053_v58 = vsel %vm206_vm3, %v2062_v56, 0.0 }
 0xd4b   :  { %v1288_v60 = vpop.xlane.xlu0 %1287  ;;  %1054 = vadd.xlane.f32.xlu1 %v1053_v58 }
 0xd4c   :  { %2069 = vpow2.f32 %v1291_v57  ;;  %v1290_v61 = vsub.f32 %v1280_v23, %v1288_v60 }
 0xd4d   :  { %v2064_v26 = vpop.eup %2063 }
 0xd4e   :  { %v1293_v50 = vmul.f32 1.442695, %v1290_v61  ;;  %v1056_v62 = vsel %vm206_vm3, %v2064_v26, 0.0 }
 0xd4f   :  { %v1406_v1 = vpop.xlane.xlu1 %1405  ;;  %1057 = vadd.xlane.f32.xlu0 %v1056_v62 }
 0xd50   :  { %2071 = vpow2.f32 %v1293_v50  ;;  %v1410_v7 = vsub.f32 %v1398_v31, %v1406_v1 }
 0xd51   :  { %v2066_v2 = vpop.eup %2065 }
 0xd52   :  { %v1412_v3 = vmul.f32 1.442695, %v1410_v7  ;;  %v1174_v4 = vsel %vm206_vm3, %v2066_v2, 0.0 }
 0xd53   :  { %1175 = vadd.xlane.f32.xlu1 %v1174_v4  ;;  %v1065_v12 = vpop.permute.xlu1 %1064  ;;  %v1409_v55 = vpop.xlane.xlu0 %1408 }
 0xd54   :  { %2073 = vpow2.f32 %v1412_v3  ;;  %v1411_v9 = vsub.f32 %v1401_v37, %v1409_v55  ;;  %1890 = vmatpush3.bf16.msra.mxu1 %v1065_v12 }
 0xd55   :  { %v2068_v10 = vpop.eup %2067  ;;  %1901 = vmatprep.subr.bf16.mxu1 %v2119_v15 }
 0xd56   :  { %v1414_v11 = vmul.f32 1.442695, %v1411_v9  ;;  %v1177_v13 = vsel %vm206_vm3, %v2068_v10, 0.0 }
 0xd57   :  { %1178 = vadd.xlane.f32.xlu0 %v1177_v13 }
 0xd58   :  { %2075 = vpow2.f32 %v1414_v11 }
 0xd59   :  { %v2070_v17 = vpop.eup %2069 }
 0xd5a   :  { %v1295_v18 = vsel %vm206_vm3, %v2070_v17, 0.0 }
 0xd5b   :  { %1296 = vadd.xlane.f32.xlu1 %v1295_v18 }
 0xd5d   :  { %v2072_v19 = vpop.eup %2071 }
 0xd5e   :  { %v1298_v20 = vsel %vm206_vm3, %v2072_v19, 0.0 }
 0xd5f   :  { %1299 = vadd.xlane.f32.xlu0 %v1298_v20 }
 0xd61   :  { %v2074_v21 = vpop.eup %2073 }
 0xd62   :  { %v1416_v23 = vsel %vm206_vm3, %v2074_v21, 0.0 }
 0xd63   :  { %1417 = vadd.xlane.f32.xlu1 %v1416_v23 }
 0xd65   :  { %v2076_v25 = vpop.eup %2075 }
 0xd66   :  { %v1419_v27 = vsel %vm206_vm3, %v2076_v25, 0.0 }
 0xd67   :  { %1420 = vadd.xlane.f32.xlu0 %v1419_v27 }
 0xd74   :  { %1306 = vrot.lane.b32.xlu1 %v2483_v46, %s2129_s19 }
 0xd78   :  { %1427 = vrot.lane.b32.xlu1 %v2483_v46, %s2130_s20 }
 0xd7d   :  { %1185 = vrot.lane.b32.xlu0 %v2483_v46, %s2131_s21 }
 0xdd4   :  { %v1055_v28 = vpop.xlane.xlu1 %1054 }
 0xdd5   :  { %2077 = vrcp.f32 %v1055_v28 }
 0xdd8   :  { %v1058_v31 = vpop.xlane.xlu0 %1057 }
 0xdd9   :  { %2079 = vrcp.f32 %v1058_v31 }
 0xddc   :  { %v1176_v33 = vpop.xlane.xlu1 %1175 }
 0xde0   :  { %v1179_v32 = vpop.xlane.xlu0 %1178 }
 0xde1   :  { %2081 = vrcp.f32 %v1179_v32 }
 0xde2   :  { %v2078_v35 = vpop.eup %2077  ;;  %2083 = vrcp.f32 %v1176_v33 }
 0xde3   :  { %v1061_v47 = vmul.f32 %v2078_v35, %v2062_v56 }
 0xde4   :  { %v1297_v42 = vpop.xlane.xlu1 %1296 }
 0xde6   :  { %v2080_v37 = vpop.eup %2079 }
 0xde7   :  { %v1062_v39 = vmul.f32 %v2080_v37, %v2064_v26 }
 0xde8   :  { %v1300_v40 = vpop.xlane.xlu0 %1299 }
 0xde9   :  { %v1063_v43 = vpack.c.bf16 %v1062_v39, %v1061_v47  ;;  %2085 = vrcp.f32 %v1300_v40 }
 0xdea   :  { %2087 = vrcp.f32 %v1297_v42 }
 0xdeb   :  { %1892 = vmatmul.mubr.msk.bf16.vlgmr.msra.gmra.mxu1 %vm206_vm3, %v1063_v43 }
 0xdec   :  { %1903 = vmatprep.mubr.msk.bf16.mxu1 %vm2120_vm1, %v2119_v15  ;;  %v1418_v29 = vpop.xlane.xlu1 %1417 }
 0xdee   :  { %v2082_v46 = vpop.eup %2081 }
 0xdef   :  { %v2084_v59 = vpop.eup %2083  ;;  %v1183_v34 = vmul.f32 %v2082_v46, %v2068_v10 }
 0xdf0   :  { %v1421_v44 = vpop.xlane.xlu0 %1420  ;;  %v1182_v48 = vmul.f32 %v2084_v59, %v2066_v2  ;;  %v1307_v51 = vpop.permute.xlu1 %1306 }
 0xdf1   :  { %2089 = vrcp.f32 %v1421_v44 }
 0xdf2   :  { %2091 = vrcp.f32 %v1418_v29  ;;  %v1184_v49 = vpack.c.bf16 %v1183_v34, %v1182_v48 }
 0xdf4   :  { %v1186_v41 = vpop.permute.xlu0 %1185  ;;  %v1428_v60 = vpop.permute.xlu1 %1427 }
 0xdf5   :  { %1902 = vmatpush3.bf16.msra.mxu1 %v1186_v41 }
 0xdf6   :  { %1913 = vmatprep.subr.bf16.mxu1 %v2119_v15  ;;  %v2086_v63 = vpop.eup %2085 }
 0xdf7   :  { %v2088_v53 = vpop.eup %2087  ;;  %v1304_v54 = vmul.f32 %v2086_v63, %v2072_v19 }
 0xdf8   :  { %1904 = vmatmul.mubr.msk.bf16.vlgmr.msra.gmra.mxu1 %vm206_vm3, %v1184_v49  ;;  %v1303_v56 = vmul.f32 %v2088_v53, %v2070_v17 }
 0xdf9   :  { %1914 = vmatpush3.bf16.msra.mxu1 %v1307_v51  ;;  %1915 = vmatprep.mubr.msk.bf16.mxu1 %vm2120_vm1, %v2119_v15 }
 0xdfa   :  { %1925 = vmatprep.subr.bf16.mxu1 %v2119_v15  ;;  %v1305_v57 = vpack.c.bf16 %v1304_v54, %v1303_v56 }
 0xdfe   :  { %v2090_v58 = vpop.eup %2089 }
 0xdff   :  { %v2092_v61 = vpop.eup %2091  ;;  %v1425_v26 = vmul.f32 %v2090_v58, %v2076_v25 }
 0xe00   :  { %1916 = vmatmul.mubr.msk.bf16.vlgmr.msra.gmra.mxu1 %vm206_vm3, %v1305_v57  ;;  %v1424_v50 = vmul.f32 %v2092_v61, %v2074_v21 }
 0xe01   :  { %1926 = vmatpush3.bf16.msra.mxu1 %v1428_v60  ;;  %1927 = vmatprep.mubr.msk.bf16.mxu1 %vm2120_vm1, %v2119_v15 }
 0xe02   :  { %1939 = vmatprep.subr.bf16.mxu1 %v2119_v15  ;;  %v1426_v62 = vpack.c.bf16 %v1425_v26, %v1424_v50 }
 0xe08   :  { %1928 = vmatmul.mubr.msk.bf16.vlgmr.msra.gmra.mxu1 %vm206_vm3, %v1426_v62 }
 0xe09   :  { %1940 = vmatpush3.bf16.msra.mxu1 %v2387_v5  ;;  %1943 = vmatprep.mubr.msk.bf16.mxu1 %vm2120_vm1, %v2119_v15 }
 0xe0a   :  { %1941 = vmatprep.subr.bf16.mxu1 %v2119_v15 }
 0xe0d   :  { %1942 = vmatpush3.bf16.msra.mxu1 %v2393_v6 }
 0xeab   :  { %v1104_v1 = vpop.f32.mrf.mxu1 }
 0xead   :  { %v1893_v7 = vpop.f32.mrf.mxu1 }
 0xeaf   :  { %v1107_v2 = vpop.f32.mrf.mxu1 }
 0xeb1   :  { %v1894_v3 = vpop.f32.mrf.mxu1 }
 0xeb8   :  { %v1225_v4 = vpop.f32.mrf.mxu1 }
 0xeba   :  { %v1905_v12 = vpop.f32.mrf.mxu1 }
 0xebc   :  { %v1228_v55 = vpop.f32.mrf.mxu1 }
 0xebd   :  { %v1992_v9 = vpack.i.bf16 %v1228_v55, %v1225_v4 }
 0xebe   :  { %v1906_v10 = vpop.f32.mrf.mxu1 }
 0xebf   :  { %1993 = vrot.lane.b32.xlu1 %v1992_v9, %s2132_s24 }
 0xec0   :  { %v1346_v11 = vpop.f32.mrf.mxu1 }
 0xec2   :  { %v1917_v5 = vpop.f32.mrf.mxu1 }
 0xec4   :  { %v1349_v13 = vpop.f32.mrf.mxu1 }
 0xec5   :  { %v1997_v17 = vpack.i.bf16 %v1349_v13, %v1346_v11 }
 0xec6   :  { %v1918_v18 = vpop.f32.mrf.mxu1 }
 0xec7   :  { %1998 = vrot.lane.b32.xlu0 %v1997_v17, %s2133_s27 }
 0xec8   :  { %v1467_v19 = vpop.f32.mrf.mxu1 }
 0xeca   :  { %v1929_v6 = vpop.f32.mrf.mxu1 }
 0xecc   :  { %v1470_v20 = vpop.f32.mrf.mxu1 }
 0xecd   :  { %v2002_v21 = vpack.i.bf16 %v1470_v20, %v1467_v19 }
 0xece   :  { %v1930_v23 = vpop.f32.mrf.mxu1 }
 0xecf   :  { %2003 = vrot.lane.b32.xlu1 %v2002_v21, %s2134_s0 }
 0xf31   :  { %v1994_v25 = vpop.permute.xlu1 %1993 }
 0xf32   :  { %v1996_v28 = vunpack.i.h.bf16 %v1994_v25  ;;  %v1995_v31 = vunpack.i.l.bf16 %v1994_v25 }
 0xf34   :  { %v1499_v37 = vsel %vm158_vm2, %v1107_v2, %v1996_v28  ;;  %v1498_v47 = vsel %vm158_vm2, %v1104_v1, %v1995_v31 }
 0xf39   :  { %v1999_v27 = vpop.permute.xlu0 %1998 }
 0xf3a   :  { %v2001_v32 = vunpack.i.h.bf16 %v1999_v27  ;;  %v2000_v33 = vunpack.i.l.bf16 %v1999_v27 }
 0xf3c   :  { %v1501_v42 = vsel %vm206_vm3, %v1499_v37, %v2001_v32  ;;  %v1500_v43 = vsel %vm206_vm3, %v1498_v47, %v2000_v33 }
 0xf41   :  { %v2004_v35 = vpop.permute.xlu1 %2003 }
 0xf42   :  { %v2006_v39 = vunpack.i.h.bf16 %v2004_v35  ;;  %v2005_v40 = vunpack.i.l.bf16 %v2004_v35 }
 0xf44   :  { %v1503_v46 = vsel %vm668_vm4, %v1501_v42, %v2006_v39  ;;  %v1502_v44 = vsel %vm668_vm4, %v1500_v43, %v2005_v40 }
 0xf45   :  { %v1504_v59 = vpack.c.bf16 %v1503_v46, %v1502_v44 }
 0xf47   :  { %1936 = vmatmul.mubr.msk.bf16.vlgmr.msra.gmra.mxu0 %vm53_vm0, %v1504_v59 }
 0xf48   :  { %1948 = vmatpush3.bf16.msra.mxu0 %v2401_v8  ;;  %1955 = vmatprep.mubr.msk.bf16.mxu0 %vm2120_vm1, %v2119_v15 }
 0xf49   :  { %1949 = vmatprep.subr.bf16.mxu0 %v2119_v15 }
 0xf4c   :  { %1950 = vmatpush3.bf16.msra.mxu0 %v2427_v36 }
 0xf4d   :  { %1951 = vmatprep.subr.bf16.mxu0 %v2119_v15 }
 0xf50   :  { %1952 = vmatpush3.bf16.msra.mxu0 %v2434_v14 }
 0xf51   :  { %1953 = vmatprep.subr.bf16.mxu0 %v2119_v15 }
 0xf54   :  { %1954 = vmatpush3.bf16.msra.mxu0 %v2441_v16 }
0x1007   :  { %v1542_v29 = vpop.f32.mrf.mxu0 }
0x1008   :  { %v1549_v34 = vadd.f32 %v1542_v29, %v2460_v0 }
0x1009   :  { %v1937_v41 = vpop.f32.mrf.mxu0 }
0x100a   :  { %v1551_v8 = vadd.f32 %v1549_v34, %v2366_v45 }
0x100b   :  { %v1545_v48 = vpop.f32.mrf.mxu0 }
0x100c   :  { %v1550_v49 = vadd.f32 %v1545_v48, %v2466_v24  ;;  %v1553_v63 = vsel %vm53_vm0, %v1551_v8, 0.0 }
0x100d   :  { %1554 = vadd.xlane.f32.xlu0 %v1553_v63  ;;  %v1938_v36 = vpop.f32.mrf.mxu0 }
0x100e   :  { %v1552_v51 = vadd.f32 %v1550_v49, %v2366_v45 }
0x1010   :  { %v1556_v14 = vsel %vm53_vm0, %v1552_v51, 0.0 }
0x1011   :  { %1557 = vadd.xlane.f32.xlu1 %v1556_v14 }
0x1096   :  { %v1555_v15 = vpop.xlane.xlu0 %1554 }
0x1097   :  { %v1559_v16 = vmul.f32 0.03125, %v1555_v15 }
0x1099   :  { %v1561_v53 = vsub.f32 %v1551_v8, %v1559_v16 }
0x109a   :  { %v1558_v54 = vpop.xlane.xlu1 %1557 }
0x109b   :  { %v1560_v0 = vmul.f32 0.03125, %v1558_v54  ;;  %v1563_v56 = vmul.f32 %v1561_v53, %v1561_v53 }
0x109d   :  { %v1562_v57 = vsub.f32 %v1552_v51, %v1560_v0  ;;  %v1565_v58 = vsel %vm53_vm0, %v1563_v56, 0.0 }
0x109e   :  { %1566 = vadd.xlane.f32.xlu0 %v1565_v58 }
0x109f   :  { %v1564_v24 = vmul.f32 %v1562_v57, %v1562_v57 }
0x10a1   :  { %v1568_v60 = vsel %vm53_vm0, %v1564_v24, 0.0 }
0x10a2   :  { %1569 = vadd.xlane.f32.xlu0 %v1568_v60 }
0x1127   :  { %v1567_v61 = vpop.xlane.xlu0 %1566 }
0x1128   :  { %v1571_v26 = vmul.f32 0.03125, %v1567_v61 }
0x112a   :  { %v1573_v45 = vadd.f32 1e-05, %v1571_v26 }
0x112b   :  { %v1570_v50 = vpop.xlane.xlu0 %1569 }
0x112c   :  { %2093 = vrsqrt.f32 %v1573_v45  ;;  %v1572_v62 = vmul.f32 0.03125, %v1570_v50 }
0x112e   :  { %v1574_v1 = vadd.f32 1e-05, %v1572_v62 }
0x1130   :  { %2095 = vrsqrt.f32 %v1574_v1 }
0x1139   :  { %v2094_v7 = vpop.eup %2093 }
0x113a   :  { %v1577_v2 = vmul.f32 %v2094_v7, %v1561_v53 }
0x113c   :  { %v1579_v12 = vmul.f32 %v1577_v2, %v2407_v22 }
0x113d   :  { %v2096_v3 = vpop.eup %2095 }
0x113e   :  { %v1578_v4 = vmul.f32 %v2096_v3, %v1562_v57  ;;  %v1581_v9 = vadd.f32 %v1579_v12, %v2412_v30 }
0x1140   :  { %v1580_v55 = vmul.f32 %v1578_v4, %v2407_v22 }
0x1142   :  { %v1582_v10 = vadd.f32 %v1580_v55, %v2412_v30 }
0x1144   :  { %v1583_v11 = vpack.c.bf16 %v1582_v10, %v1581_v9 }
0x1146   :  { %1944 = vmatmul.mubr.msk.bf16.vlgmr.msra.gmra.mxu1 %vm53_vm0, %v1583_v11 }
0x1206   :  { %v1621_v5 = vpop.f32.mrf.mxu1 }
0x1207   :  { %v1622_v17 = vadd.f32 %v1621_v5, %v2447_v38 }
0x1208   :  { %v1945_v13 = vpop.f32.mrf.mxu1 }
0x1209   :  { %v1628_v20 = vmax.f32 %v1622_v17, 0.0 }
0x120a   :  { %v1624_v18 = vpop.f32.mrf.mxu1 }
0x120b   :  { %v1625_v19 = vadd.f32 %v1624_v18, %v2447_v38 }
0x120c   :  { %v1946_v6 = vpop.f32.mrf.mxu1 }
0x120d   :  { %v1629_v21 = vmax.f32 %v1625_v19, 0.0 }
0x120f   :  { %v1630_v23 = vpack.c.bf16 %v1629_v21, %v1628_v20 }
0x1211   :  { %1956 = vmatmul.mubr.msk.bf16.vlgmr.msra.gmra.mxu0 %vm862_vm5, %v1630_v23 }
0x12d1   :  { %v1668_v22 = vpop.f32.mrf.mxu0 }
0x12d2   :  { %v1675_v25 = vadd.f32 %v1668_v22, %v1551_v8 }
0x12d3   :  { %v1957_v27 = vpop.f32.mrf.mxu0 }
0x12d4   :  { %v1677_v30 = vadd.f32 %v1675_v25, %v2456_v52 }
0x12d5   :  { %v1671_v28 = vpop.f32.mrf.mxu0 }
0x12d6   :  { %1679 = vst.msk [vmem:[#allocation2] sm:$0xff] %vm53_vm0, %v1677_v30  ;;  %v1676_v31 = vadd.f32 %v1671_v28, %v1552_v51 }
0x12d7   :  { %v1958_v32 = vpop.f32.mrf.mxu0 }
0x12d8   :  { %v1678_v38 = vadd.f32 %v1676_v31, %v2456_v52 }
0x12da   :  { %1680 = vst.msk [vmem:[#allocation2 + $0x8] sm:$0xff] %vm53_vm0, %v1678_v38 }
0x12db   :  { %2108 = shalt.err (!%p2105_p4)
}
0x12dc   :  { %s2136_s10 = smov 128  }
0x12dd   :  { %1692 = dma.vmem_to_hbm [thread:$0]  %s1687_s2, 256, %s2625_s7, [#allocation3], %s2136_s10, %s2136_s10, %s2132_s24  }
0x12de   :  { %2117 = dma.done.wait [#allocation3], 256  }
0x12df   :  { %2118 = vsyncadd [#allocation3], 4294967040 }
0x12e0   :  { %1696 = vsyncpa [#allocation3], 1 }

</bundles_post_ra>
